<compile_context>
chip_gen: v6e
topology: v6e:2x2x1
jax: 0.10.0
libtpu: 0.0.40
codegen_flags: <defaults>
</compile_context>

<pallas_src>
import math

import jax
import jax.numpy as jnp
from jax import lax
from jax.experimental import pallas as pl
from jax.experimental.pallas import tpu as pltpu

# ------------------------- small synthetic BERT config -------------------------
VOCAB_SIZE = 100
TYPE_VOCAB_SIZE = 2
MAX_POSITIONS = 16
HIDDEN = 32
NUM_LAYERS = 2
NUM_HEADS = 2
HEAD_DIM = HIDDEN // NUM_HEADS
INTERMEDIATE = 64
SEQ_NUM_LABELS = 5
TOKEN_NUM_LABELS = 7
LOGITS_PAD = 128          # lane-dense classifier output width (sliced back in JAX)
LN_EPS = 1e-12
BATCH = 2
SEQ = 8


# ------------------------------ fused Pallas kernel ------------------------------
def _fused_bert_kernel(
    emb_ref, mask_ref, emb_ln_g_ref, emb_ln_b_ref,
    qkv_w_ref, qkv_b_ref, ao_w_ref, ao_b_ref,
    attn_ln_g_ref, attn_ln_b_ref,
    ffn_w1_ref, ffn_b1_ref, ffn_w2_ref, ffn_b2_ref,
    ffn_ln_g_ref, ffn_ln_b_ref,
    pool_w_ref, pool_b_ref, seq_w_ref, seq_b_ref, tok_w_ref, tok_b_ref,
    seq_out_ref, tok_out_ref,
    x_ref, ctx_ref,
):
    """One grid step == one encoder layer.

    x_ref (VMEM scratch) carries the (B*S, H) activations across layers.
    Step 0 additionally applies the embedding LayerNorm; the last step runs the
    pooler + both classification heads (lane-padded to LOGITS_PAD columns).
    """
    layer = pl.program_id(0)
    n_layers = pl.num_programs(0)
    B, S = mask_ref.shape
    H = HIDDEN
    scale = 1.0 / math.sqrt(HEAD_DIM)

    def layernorm(v, g, b):
        mean = jnp.mean(v, axis=-1, keepdims=True)
        var = jnp.mean(jnp.square(v - mean), axis=-1, keepdims=True)
        return (v - mean) * lax.rsqrt(var + LN_EPS) * g + b

    # ---- embedding LayerNorm (first step only; no zeros residual slab) ----
    @pl.when(layer == 0)
    def _():
        x_ref[...] = layernorm(emb_ref[...], emb_ln_g_ref[...], emb_ln_b_ref[...])

    x = x_ref[...]                                               # (B*S, H) f32

    # ---- fused QKV projection: one lane-dense (H -> 3H) matmul ----
    qkv = (jnp.dot(x, qkv_w_ref[...], preferred_element_type=jnp.float32)
           + qkv_b_ref[...])                                     # (B*S, 3H)
    mask = mask_ref[...]                                         # (B, S) additive bias

    # ---- self-attention: static loop over (batch, head); head slices = lane slices ----
    for b in range(B):
        r0, r1 = b * S, (b + 1) * S
        bias_b = mask[b:b + 1, :]                                # (1, S)
        for h in range(NUM_HEADS):
            c0 = h * HEAD_DIM
            q_bh = qkv[r0:r1, c0:c0 + HEAD_DIM]                  # (S, Dh)
            k_bh = qkv[r0:r1, H + c0:H + c0 + HEAD_DIM]
            v_bh = qkv[r0:r1, 2 * H + c0:2 * H + c0 + HEAD_DIM]
            s = lax.dot_general(q_bh, k_bh, (((1,), (1,)), ((), ())),
                                preferred_element_type=jnp.float32) * scale
            s = s + bias_b                                       # (S, S)
            p = jnp.exp(s - jnp.max(s, axis=-1, keepdims=True))
            p = p * pl.reciprocal(jnp.sum(p, axis=-1, keepdims=True), approx=True)
            ctx_ref[r0:r1, c0:c0 + HEAD_DIM] = jnp.dot(
                p, v_bh, preferred_element_type=jnp.float32)

    ctx = ctx_ref[...]                                           # (B*S, H)

    # ---- attention output projection + add & LayerNorm ----
    attn_out = (jnp.dot(ctx, ao_w_ref[...], preferred_element_type=jnp.float32)
                + ao_b_ref[...])
    x1 = layernorm(attn_out + x, attn_ln_g_ref[...], attn_ln_b_ref[...])

    # ---- FFN (GELU) + add & LayerNorm ----
    # TODO(synk): BERT uses exact erf-GELU; tanh approximation used here.
    hmid = (jnp.dot(x1, ffn_w1_ref[...], preferred_element_type=jnp.float32)
            + ffn_b1_ref[...])
    hmid = 0.5 * hmid * (1.0 + jnp.tanh(
        0.7978845608028654 * (hmid + 0.044715 * hmid * hmid * hmid)))
    ffn_out = (jnp.dot(hmid, ffn_w2_ref[...], preferred_element_type=jnp.float32)
               + ffn_b2_ref[...])
    x2 = layernorm(ffn_out + x1, ffn_ln_g_ref[...], ffn_ln_b_ref[...])
    x_ref[...] = x2

    # ---- last step: pooler + both classification heads (lane-padded outputs) ----
    @pl.when(layer == n_layers - 1)
    def _():
        # pooler computed over all rows (trivial extra work); CLS rows picked below
        pooled_all = jnp.tanh(
            jnp.dot(x2, pool_w_ref[...], preferred_element_type=jnp.float32)
            + pool_b_ref[...])                                   # (B*S, H)
        seq_all = (jnp.dot(pooled_all, seq_w_ref[...],
                           preferred_element_type=jnp.float32)
                   + seq_b_ref[...])                             # (B*S, 128)
        for b in range(B):
            seq_out_ref[b:b + 1, :] = seq_all[b * S:b * S + 1, :].astype(
                seq_out_ref.dtype)
        tok_out_ref[...] = (jnp.dot(x2, tok_w_ref[...],
                                    preferred_element_type=jnp.float32)
                            + tok_b_ref[...]).astype(tok_out_ref.dtype)


def _fused_bert(params, emb, mask_bias):
    """Single pallas_call running embeddings-LN + all encoder layers + heads."""
    M, H = emb.shape
    B, S = mask_bias.shape
    L = params["qkv_w"].shape[0]

    def full(arr):
        return pl.BlockSpec(arr.shape, lambda l: (0,) * arr.ndim)

    def per_layer(arr):  # (L, a, b) -> kernel sees (a, b) for the current layer
        return pl.BlockSpec((None,) + arr.shape[1:], lambda l: (l, 0, 0))

    in_specs = [
        full(emb), full(mask_bias),
        full(params["emb_ln_g"]), full(params["emb_ln_b"]),
        per_layer(params["qkv_w"]), per_layer(params["qkv_b"]),
        per_layer(params["ao_w"]), per_layer(params["ao_b"]),
        per_layer(params["attn_ln_g"]), per_layer(params["attn_ln_b"]),
        per_layer(params["ffn_w1"]), per_layer(params["ffn_b1"]),
        per_layer(params["ffn_w2"]), per_layer(params["ffn_b2"]),
        per_layer(params["ffn_ln_g"]), per_layer(params["ffn_ln_b"]),
        full(params["pool_w"]), full(params["pool_b"]),
        full(params["seq_cls_w_pad"]), full(params["seq_cls_b_pad"]),
        full(params["tok_cls_w_pad"]), full(params["tok_cls_b_pad"]),
    ]
    out_specs = [
        pl.BlockSpec((B, LOGITS_PAD), lambda l: (0, 0)),
        pl.BlockSpec((M, LOGITS_PAD), lambda l: (0, 0)),
    ]
    grid_spec = pltpu.PrefetchScalarGridSpec(
        num_scalar_prefetch=0,
        grid=(L,),
        in_specs=in_specs,
        out_specs=out_specs,
        scratch_shapes=[
            pltpu.VMEM((M, H), jnp.float32),   # resident activations x
            pltpu.VMEM((M, H), jnp.float32),   # attention context
        ],
    )
    return pl.pallas_call(
        _fused_bert_kernel,
        out_shape=(jax.ShapeDtypeStruct((B, LOGITS_PAD), jnp.float32),
                   jax.ShapeDtypeStruct((M, LOGITS_PAD), jnp.float32)),
        grid_spec=grid_spec,
        compiler_params=pltpu.CompilerParams(
            dimension_semantics=("arbitrary",)),   # sequential over layers
    )(emb, mask_bias, params["emb_ln_g"], params["emb_ln_b"],
      params["qkv_w"], params["qkv_b"], params["ao_w"], params["ao_b"],
      params["attn_ln_g"], params["attn_ln_b"],
      params["ffn_w1"], params["ffn_b1"], params["ffn_w2"], params["ffn_b2"],
      params["ffn_ln_g"], params["ffn_ln_b"],
      params["pool_w"], params["pool_b"],
      params["seq_cls_w_pad"], params["seq_cls_b_pad"],
      params["tok_cls_w_pad"], params["tok_cls_b_pad"])


# ------------------------------ parameters --------------------------------------
def init_params(key):
    def normal(k, shape, scale=0.02):
        return scale * jax.random.normal(k, shape, dtype=jnp.float32)

    keys = jax.random.split(key, 8 + NUM_LAYERS)
    params = {
        "word_emb": normal(keys[0], (VOCAB_SIZE, HIDDEN)),
        "pos_emb": normal(keys[1], (MAX_POSITIONS, HIDDEN)),
        "type_emb": normal(keys[2], (TYPE_VOCAB_SIZE, HIDDEN)),
        "emb_ln_g": jnp.ones((1, HIDDEN), jnp.float32),
        "emb_ln_b": jnp.zeros((1, HIDDEN), jnp.float32),
        "pool_w": normal(keys[3], (HIDDEN, HIDDEN)),
        "pool_b": jnp.zeros((1, HIDDEN), jnp.float32),
    }
    # classifier heads, lane-padded to LOGITS_PAD (padded columns are zero)
    seq_w = normal(keys[4], (HIDDEN, SEQ_NUM_LABELS))
    tok_w = normal(keys[5], (HIDDEN, TOKEN_NUM_LABELS))
    params["seq_cls_w_pad"] = jnp.pad(seq_w, ((0, 0), (0, LOGITS_PAD - SEQ_NUM_LABELS)))
    params["seq_cls_b_pad"] = jnp.zeros((1, LOGITS_PAD), jnp.float32)
    params["tok_cls_w_pad"] = jnp.pad(tok_w, ((0, 0), (0, LOGITS_PAD - TOKEN_NUM_LABELS)))
    params["tok_cls_b_pad"] = jnp.zeros((1, LOGITS_PAD), jnp.float32)

    qkv_w, ao_w, ffn_w1, ffn_w2 = [], [], [], []
    for l in range(NUM_LAYERS):
        lk = jax.random.split(keys[8 + l], 6)
        qkv_w.append(jnp.concatenate(
            [normal(lk[0], (HIDDEN, HIDDEN)),
             normal(lk[1], (HIDDEN, HIDDEN)),
             normal(lk[2], (HIDDEN, HIDDEN))], axis=1))          # fused Q|K|V
        ao_w.append(normal(lk[3], (HIDDEN, HIDDEN)))
        ffn_w1.append(normal(lk[4], (HIDDEN, INTERMEDIATE)))
        ffn_w2.append(normal(lk[5], (INTERMEDIATE, HIDDEN)))
    L = NUM_LAYERS
    params.update({
        "qkv_w": jnp.stack(qkv_w),                               # (L, H, 3H)
        "qkv_b": jnp.zeros((L, 1, 3 * HIDDEN), jnp.float32),
        "ao_w": jnp.stack(ao_w),                                 # (L, H, H)
        "ao_b": jnp.zeros((L, 1, HIDDEN), jnp.float32),
        "attn_ln_g": jnp.ones((L, 1, HIDDEN), jnp.float32),
        "attn_ln_b": jnp.zeros((L, 1, HIDDEN), jnp.float32),
        "ffn_w1": jnp.stack(ffn_w1),                             # (L, H, I)
        "ffn_b1": jnp.zeros((L, 1, INTERMEDIATE), jnp.float32),
        "ffn_w2": jnp.stack(ffn_w2),                             # (L, I, H)
        "ffn_b2": jnp.zeros((L, 1, HIDDEN), jnp.float32),
        "ffn_ln_g": jnp.ones((L, 1, HIDDEN), jnp.float32),
        "ffn_ln_b": jnp.zeros((L, 1, HIDDEN), jnp.float32),
    })
    return params


# ------------------------------ forward pass -------------------------------------
@jax.jit
def bert_intent_slot_forward(params, input_ids, attention_mask, token_type_ids):
    B, S = input_ids.shape

    # embedding gathers are glue; everything else runs inside the fused kernel
    emb = (params["word_emb"][input_ids]
           + params["pos_emb"][:S][None, :, :]
           + params["type_emb"][token_type_ids]).reshape(B * S, HIDDEN)

    # HF-BERT style additive attention mask, kept as a compact (B, S) slab
    mask_bias = (1.0 - attention_mask.astype(jnp.float32)) * -10000.0

    seq_pad, tok_pad = _fused_bert(params, emb, mask_bias)

    # slice the lane-padded logits back to the real label counts
    seq_logits = seq_pad[:, :SEQ_NUM_LABELS]
    tok_logits = tok_pad.reshape(B, S, LOGITS_PAD)[:, :, :TOKEN_NUM_LABELS]
    return seq_logits, tok_logits


if __name__ == "__main__":
    key = jax.random.PRNGKey(0)
    pkey, ikey = jax.random.split(key)
    params = init_params(pkey)

    input_ids = jax.random.randint(ikey, (BATCH, SEQ), 0, VOCAB_SIZE, dtype=jnp.int32)
    attention_mask = jnp.ones((BATCH, SEQ), jnp.int32).at[1, 6:].set(0)
    token_type_ids = jnp.zeros((BATCH, SEQ), jnp.int32)

    seq_logits, tok_logits = bert_intent_slot_forward(
        params, input_ids, attention_mask, token_type_ids)
    jax.block_until_ready((seq_logits, tok_logits))

    assert seq_logits.shape == (BATCH, SEQ_NUM_LABELS)
    assert tok_logits.shape == (BATCH, SEQ, TOKEN_NUM_LABELS)
    print("KERNEL_OK")
</pallas_src>

<mosaic_0001>
module attributes {stable_mosaic.version = 11 : i64} {
  func.func @_fused_bert_kernel(%arg0: i32, %arg1: memref<16x32xf32, #tpu.memory_space<vmem>>, %arg2: memref<2x8xf32, #tpu.memory_space<vmem>>, %arg3: memref<1x32xf32, #tpu.memory_space<vmem>>, %arg4: memref<1x32xf32, #tpu.memory_space<vmem>>, %arg5: memref<1x32x96xf32, #tpu.memory_space<vmem>>, %arg6: memref<1x1x96xf32, #tpu.memory_space<vmem>>, %arg7: memref<1x32x32xf32, #tpu.memory_space<vmem>>, %arg8: memref<1x1x32xf32, #tpu.memory_space<vmem>>, %arg9: memref<1x1x32xf32, #tpu.memory_space<vmem>>, %arg10: memref<1x1x32xf32, #tpu.memory_space<vmem>>, %arg11: memref<1x32x64xf32, #tpu.memory_space<vmem>>, %arg12: memref<1x1x64xf32, #tpu.memory_space<vmem>>, %arg13: memref<1x64x32xf32, #tpu.memory_space<vmem>>, %arg14: memref<1x1x32xf32, #tpu.memory_space<vmem>>, %arg15: memref<1x1x32xf32, #tpu.memory_space<vmem>>, %arg16: memref<1x1x32xf32, #tpu.memory_space<vmem>>, %arg17: memref<32x32xf32, #tpu.memory_space<vmem>>, %arg18: memref<1x32xf32, #tpu.memory_space<vmem>>, %arg19: memref<32x128xf32, #tpu.memory_space<vmem>>, %arg20: memref<1x128xf32, #tpu.memory_space<vmem>>, %arg21: memref<32x128xf32, #tpu.memory_space<vmem>>, %arg22: memref<1x128xf32, #tpu.memory_space<vmem>>, %arg23: memref<2x128xf32, #tpu.memory_space<vmem>>, %arg24: memref<16x128xf32, #tpu.memory_space<vmem>>, %arg25: memref<16x32xf32, #tpu.memory_space<vmem>>, %arg26: memref<16x32xf32, #tpu.memory_space<vmem>>) attributes {dimension_semantics = [#tpu.dimension_semantics<arbitrary>], iteration_bounds = array<i64: 2>, scalar_prefetch = 0 : i64, scratch_operands = 2 : i64, tpu.core_type = #tpu.core_type<tc>, window_params = [{pipeline_mode = #tpu.pipeline_mode<synchronous>, transform_indices = @transform_0, window_bounds = array<i64: 16, 32>}, {pipeline_mode = #tpu.pipeline_mode<synchronous>, transform_indices = @transform_1, window_bounds = array<i64: 2, 8>}, {pipeline_mode = #tpu.pipeline_mode<synchronous>, transform_indices = @transform_2, window_bounds = array<i64: 1, 32>}, {pipeline_mode = #tpu.pipeline_mode<synchronous>, transform_indices = @transform_3, window_bounds = array<i64: 1, 32>}, {transform_indices = @transform_4, window_bounds = array<i64: 1, 32, 96>}, {transform_indices = @transform_5, window_bounds = array<i64: 1, 1, 96>}, {transform_indices = @transform_6, window_bounds = array<i64: 1, 32, 32>}, {transform_indices = @transform_7, window_bounds = array<i64: 1, 1, 32>}, {transform_indices = @transform_8, window_bounds = array<i64: 1, 1, 32>}, {transform_indices = @transform_9, window_bounds = array<i64: 1, 1, 32>}, {transform_indices = @transform_10, window_bounds = array<i64: 1, 32, 64>}, {transform_indices = @transform_11, window_bounds = array<i64: 1, 1, 64>}, {transform_indices = @transform_12, window_bounds = array<i64: 1, 64, 32>}, {transform_indices = @transform_13, window_bounds = array<i64: 1, 1, 32>}, {transform_indices = @transform_14, window_bounds = array<i64: 1, 1, 32>}, {transform_indices = @transform_15, window_bounds = array<i64: 1, 1, 32>}, {pipeline_mode = #tpu.pipeline_mode<synchronous>, transform_indices = @transform_16, window_bounds = array<i64: 32, 32>}, {pipeline_mode = #tpu.pipeline_mode<synchronous>, transform_indices = @transform_17, window_bounds = array<i64: 1, 32>}, {pipeline_mode = #tpu.pipeline_mode<synchronous>, transform_indices = @transform_18, window_bounds = array<i64: 32, 128>}, {pipeline_mode = #tpu.pipeline_mode<synchronous>, transform_indices = @transform_19, window_bounds = array<i64: 1, 128>}, {pipeline_mode = #tpu.pipeline_mode<synchronous>, transform_indices = @transform_20, window_bounds = array<i64: 32, 128>}, {pipeline_mode = #tpu.pipeline_mode<synchronous>, transform_indices = @transform_21, window_bounds = array<i64: 1, 128>}, {pipeline_mode = #tpu.pipeline_mode<synchronous>, transform_indices = @transform_22, window_bounds = array<i64: 2, 128>}, {pipeline_mode = #tpu.pipeline_mode<synchronous>, transform_indices = @transform_23, window_bounds = array<i64: 16, 128>}]} {
    %c0_i32 = arith.constant 0 : i32
    %0 = arith.cmpi eq, %arg0, %c0_i32 : i32
    %1 = arith.extui %0 : i1 to i32
    %c0_i32_0 = arith.constant 0 : i32
    %2 = arith.cmpi ne, %1, %c0_i32_0 : i32
    scf.if %2 {
      %c0_88 = arith.constant 0 : index
      %c0_89 = arith.constant 0 : index
      %187 = vector.load %arg1[%c0_88, %c0_89] : memref<16x32xf32, #tpu.memory_space<vmem>>, vector<16x32xf32>
      %c0_90 = arith.constant 0 : index
      %c0_91 = arith.constant 0 : index
      %188 = vector.load %arg3[%c0_90, %c0_91] : memref<1x32xf32, #tpu.memory_space<vmem>>, vector<1x32xf32>
      %c0_92 = arith.constant 0 : index
      %c0_93 = arith.constant 0 : index
      %189 = vector.load %arg4[%c0_92, %c0_93] : memref<1x32xf32, #tpu.memory_space<vmem>>, vector<1x32xf32>
      %cst_94 = arith.constant dense<0.000000e+00> : vector<16xf32>
      %190 = vector.multi_reduction <add>, %187, %cst_94 [1] : vector<16x32xf32> to vector<16xf32>
      %191 = vector.shape_cast %190 : vector<16xf32> to vector<16x1xf32>
      %cst_95 = arith.constant 3.200000e+01 : f32
      %192 = vector.broadcast %cst_95 : f32 to vector<16x1xf32>
      %193 = arith.divf %191, %192 : vector<16x1xf32>
      %194 = vector.broadcast %193 : vector<16x1xf32> to vector<16x32xf32>
      %195 = arith.subf %187, %194 : vector<16x32xf32>
      %196 = arith.mulf %195, %195 : vector<16x32xf32>
      %cst_96 = arith.constant dense<0.000000e+00> : vector<16xf32>
      %197 = vector.multi_reduction <add>, %196, %cst_96 [1] : vector<16x32xf32> to vector<16xf32>
      %198 = vector.shape_cast %197 : vector<16xf32> to vector<16x1xf32>
      %cst_97 = arith.constant 3.200000e+01 : f32
      %199 = vector.broadcast %cst_97 : f32 to vector<16x1xf32>
      %200 = arith.divf %198, %199 : vector<16x1xf32>
      %201 = vector.broadcast %193 : vector<16x1xf32> to vector<16x32xf32>
      %202 = arith.subf %187, %201 : vector<16x32xf32>
      %cst_98 = arith.constant 9.99999996E-13 : f32
      %203 = vector.broadcast %cst_98 : f32 to vector<16x1xf32>
      %204 = arith.addf %200, %203 : vector<16x1xf32>
      %205 = math.rsqrt %204 : vector<16x1xf32>
      %206 = vector.broadcast %205 : vector<16x1xf32> to vector<16x32xf32>
      %207 = arith.mulf %202, %206 : vector<16x32xf32>
      %208 = vector.broadcast %188 : vector<1x32xf32> to vector<16x32xf32>
      %209 = arith.mulf %207, %208 : vector<16x32xf32>
      %210 = vector.broadcast %189 : vector<1x32xf32> to vector<16x32xf32>
      %211 = arith.addf %209, %210 : vector<16x32xf32>
      %c0_99 = arith.constant 0 : index
      %c0_100 = arith.constant 0 : index
      %212 = vector.load %arg25[%c0_99, %c0_100] : memref<16x32xf32, #tpu.memory_space<vmem>>, vector<16x32xf32>
      tpu.vector_store %arg25[%c0_99, %c0_100], %211 {strides = array<i32>} : memref<16x32xf32, #tpu.memory_space<vmem>>, vector<16x32xf32>,
    } else {
    }
    %c0 = arith.constant 0 : index
    %c0_1 = arith.constant 0 : index
    %3 = vector.load %arg25[%c0, %c0_1] : memref<16x32xf32, #tpu.memory_space<vmem>>, vector<16x32xf32>
    %c0_2 = arith.constant 0 : index
    %c0_3 = arith.constant 0 : index
    %c0_4 = arith.constant 0 : index
    %4 = vector.load %arg5[%c0_2, %c0_3, %c0_4] : memref<1x32x96xf32, #tpu.memory_space<vmem>>, vector<1x32x96xf32>
    %5 = vector.shape_cast %4 : vector<1x32x96xf32> to vector<32x96xf32>
    %cst = arith.constant dense<0.000000e+00> : vector<16x96xf32>
    %6 = tpu.matmul %3, %5, %cst {dimension_numbers = #tpu.dot_dimension_numbers<[1], [0], [0], [1], [0, 0, 1, 1], [], []>} : vector<16x32xf32>, vector<32x96xf32>, vector<16x96xf32> -> vector<16x96xf32>
    %c0_5 = arith.constant 0 : index
    %c0_6 = arith.constant 0 : index
    %c0_7 = arith.constant 0 : index
    %7 = vector.load %arg6[%c0_5, %c0_6, %c0_7] : memref<1x1x96xf32, #tpu.memory_space<vmem>>, vector<1x1x96xf32>
    %8 = vector.shape_cast %7 : vector<1x1x96xf32> to vector<1x96xf32>
    %9 = vector.broadcast %8 : vector<1x96xf32> to vector<16x96xf32>
    %10 = arith.addf %6, %9 : vector<16x96xf32>
    %c0_8 = arith.constant 0 : index
    %c0_9 = arith.constant 0 : index
    %11 = vector.load %arg2[%c0_8, %c0_9] : memref<2x8xf32, #tpu.memory_space<vmem>>, vector<2x8xf32>
    %12 = vector.extract_strided_slice %11 {offsets = [0, 0], sizes = [1, 8], strides = [1, 1]} : vector<2x8xf32> to vector<1x8xf32>
    %13 = vector.extract_strided_slice %10 {offsets = [0, 0], sizes = [8, 16], strides = [1, 1]} : vector<16x96xf32> to vector<8x16xf32>
    %14 = vector.extract_strided_slice %10 {offsets = [0, 32], sizes = [8, 16], strides = [1, 1]} : vector<16x96xf32> to vector<8x16xf32>
    %15 = vector.extract_strided_slice %10 {offsets = [0, 64], sizes = [8, 16], strides = [1, 1]} : vector<16x96xf32> to vector<8x16xf32>
    %cst_10 = arith.constant dense<0.000000e+00> : vector<8x8xf32>
    %16 = tpu.matmul %13, %14, %cst_10 {dimension_numbers = #tpu.dot_dimension_numbers<[1], [1], [0], [0], [0, 0, 1, 0], [], []>} : vector<8x16xf32>, vector<8x16xf32>, vector<8x8xf32> -> vector<8x8xf32>
    %cst_11 = arith.constant 2.500000e-01 : f32
    %17 = vector.broadcast %cst_11 : f32 to vector<8x8xf32>
    %18 = arith.mulf %16, %17 : vector<8x8xf32>
    %19 = vector.broadcast %12 : vector<1x8xf32> to vector<8x8xf32>
    %20 = arith.addf %18, %19 : vector<8x8xf32>
    %cst_12 = arith.constant dense<0xFF800000> : vector<8xf32>
    %21 = vector.multi_reduction <maximumf>, %20, %cst_12 [1] : vector<8x8xf32> to vector<8xf32>
    %22 = vector.shape_cast %21 : vector<8xf32> to vector<8x1xf32>
    %23 = vector.broadcast %22 : vector<8x1xf32> to vector<8x8xf32>
    %24 = arith.subf %20, %23 : vector<8x8xf32>
    %25 = math.exp %24 : vector<8x8xf32>
    %cst_13 = arith.constant dense<0.000000e+00> : vector<8xf32>
    %26 = vector.multi_reduction <add>, %25, %cst_13 [1] : vector<8x8xf32> to vector<8xf32>
    %27 = vector.shape_cast %26 : vector<8xf32> to vector<8x1xf32>
    %28 = tpu.reciprocal %27 {approx = true} : vector<8x1xf32> -> vector<8x1xf32>
    %29 = vector.broadcast %28 : vector<8x1xf32> to vector<8x8xf32>
    %30 = arith.mulf %25, %29 : vector<8x8xf32>
    %cst_14 = arith.constant dense<0.000000e+00> : vector<8x16xf32>
    %31 = tpu.matmul %30, %15, %cst_14 {dimension_numbers = #tpu.dot_dimension_numbers<[1], [0], [0], [1], [0, 0, 1, 1], [], []>} : vector<8x8xf32>, vector<8x16xf32>, vector<8x16xf32> -> vector<8x16xf32>
    %c0_15 = arith.constant 0 : index
    %c0_16 = arith.constant 0 : index
    %32 = vector.load %arg26[%c0_15, %c0_16] : memref<16x32xf32, #tpu.memory_space<vmem>>, vector<8x16xf32>
    tpu.vector_store %arg26[%c0_15, %c0_16], %31 {strides = array<i32>} : memref<16x32xf32, #tpu.memory_space<vmem>>, vector<8x16xf32>,
    %33 = vector.extract_strided_slice %10 {offsets = [0, 16], sizes = [8, 16], strides = [1, 1]} : vector<16x96xf32> to vector<8x16xf32>
    %34 = vector.extract_strided_slice %10 {offsets = [0, 48], sizes = [8, 16], strides = [1, 1]} : vector<16x96xf32> to vector<8x16xf32>
    %35 = vector.extract_strided_slice %10 {offsets = [0, 80], sizes = [8, 16], strides = [1, 1]} : vector<16x96xf32> to vector<8x16xf32>
    %cst_17 = arith.constant dense<0.000000e+00> : vector<8x8xf32>
    %36 = tpu.matmul %33, %34, %cst_17 {dimension_numbers = #tpu.dot_dimension_numbers<[1], [1], [0], [0], [0, 0, 1, 0], [], []>} : vector<8x16xf32>, vector<8x16xf32>, vector<8x8xf32> -> vector<8x8xf32>
    %cst_18 = arith.constant 2.500000e-01 : f32
    %37 = vector.broadcast %cst_18 : f32 to vector<8x8xf32>
    %38 = arith.mulf %36, %37 : vector<8x8xf32>
    %39 = vector.broadcast %12 : vector<1x8xf32> to vector<8x8xf32>
    %40 = arith.addf %38, %39 : vector<8x8xf32>
    %cst_19 = arith.constant dense<0xFF800000> : vector<8xf32>
    %41 = vector.multi_reduction <maximumf>, %40, %cst_19 [1] : vector<8x8xf32> to vector<8xf32>
    %42 = vector.shape_cast %41 : vector<8xf32> to vector<8x1xf32>
    %43 = vector.broadcast %42 : vector<8x1xf32> to vector<8x8xf32>
    %44 = arith.subf %40, %43 : vector<8x8xf32>
    %45 = math.exp %44 : vector<8x8xf32>
    %cst_20 = arith.constant dense<0.000000e+00> : vector<8xf32>
    %46 = vector.multi_reduction <add>, %45, %cst_20 [1] : vector<8x8xf32> to vector<8xf32>
    %47 = vector.shape_cast %46 : vector<8xf32> to vector<8x1xf32>
    %48 = tpu.reciprocal %47 {approx = true} : vector<8x1xf32> -> vector<8x1xf32>
    %49 = vector.broadcast %48 : vector<8x1xf32> to vector<8x8xf32>
    %50 = arith.mulf %45, %49 : vector<8x8xf32>
    %cst_21 = arith.constant dense<0.000000e+00> : vector<8x16xf32>
    %51 = tpu.matmul %50, %35, %cst_21 {dimension_numbers = #tpu.dot_dimension_numbers<[1], [0], [0], [1], [0, 0, 1, 1], [], []>} : vector<8x8xf32>, vector<8x16xf32>, vector<8x16xf32> -> vector<8x16xf32>
    %c0_22 = arith.constant 0 : index
    %c16 = arith.constant 16 : index
    %52 = vector.load %arg26[%c0_22, %c16] : memref<16x32xf32, #tpu.memory_space<vmem>>, vector<8x16xf32>
    tpu.vector_store %arg26[%c0_22, %c16], %51 {strides = array<i32>} : memref<16x32xf32, #tpu.memory_space<vmem>>, vector<8x16xf32>,
    %53 = vector.extract_strided_slice %11 {offsets = [1, 0], sizes = [1, 8], strides = [1, 1]} : vector<2x8xf32> to vector<1x8xf32>
    %54 = vector.extract_strided_slice %10 {offsets = [8, 0], sizes = [8, 16], strides = [1, 1]} : vector<16x96xf32> to vector<8x16xf32>
    %55 = vector.extract_strided_slice %10 {offsets = [8, 32], sizes = [8, 16], strides = [1, 1]} : vector<16x96xf32> to vector<8x16xf32>
    %56 = vector.extract_strided_slice %10 {offsets = [8, 64], sizes = [8, 16], strides = [1, 1]} : vector<16x96xf32> to vector<8x16xf32>
    %cst_23 = arith.constant dense<0.000000e+00> : vector<8x8xf32>
    %57 = tpu.matmul %54, %55, %cst_23 {dimension_numbers = #tpu.dot_dimension_numbers<[1], [1], [0], [0], [0, 0, 1, 0], [], []>} : vector<8x16xf32>, vector<8x16xf32>, vector<8x8xf32> -> vector<8x8xf32>
    %cst_24 = arith.constant 2.500000e-01 : f32
    %58 = vector.broadcast %cst_24 : f32 to vector<8x8xf32>
    %59 = arith.mulf %57, %58 : vector<8x8xf32>
    %60 = vector.broadcast %53 : vector<1x8xf32> to vector<8x8xf32>
    %61 = arith.addf %59, %60 : vector<8x8xf32>
    %cst_25 = arith.constant dense<0xFF800000> : vector<8xf32>
    %62 = vector.multi_reduction <maximumf>, %61, %cst_25 [1] : vector<8x8xf32> to vector<8xf32>
    %63 = vector.shape_cast %62 : vector<8xf32> to vector<8x1xf32>
    %64 = vector.broadcast %63 : vector<8x1xf32> to vector<8x8xf32>
    %65 = arith.subf %61, %64 : vector<8x8xf32>
    %66 = math.exp %65 : vector<8x8xf32>
    %cst_26 = arith.constant dense<0.000000e+00> : vector<8xf32>
    %67 = vector.multi_reduction <add>, %66, %cst_26 [1] : vector<8x8xf32> to vector<8xf32>
    %68 = vector.shape_cast %67 : vector<8xf32> to vector<8x1xf32>
    %69 = tpu.reciprocal %68 {approx = true} : vector<8x1xf32> -> vector<8x1xf32>
    %70 = vector.broadcast %69 : vector<8x1xf32> to vector<8x8xf32>
    %71 = arith.mulf %66, %70 : vector<8x8xf32>
    %cst_27 = arith.constant dense<0.000000e+00> : vector<8x16xf32>
    %72 = tpu.matmul %71, %56, %cst_27 {dimension_numbers = #tpu.dot_dimension_numbers<[1], [0], [0], [1], [0, 0, 1, 1], [], []>} : vector<8x8xf32>, vector<8x16xf32>, vector<8x16xf32> -> vector<8x16xf32>
    %c8 = arith.constant 8 : index
    %c0_28 = arith.constant 0 : index
    %73 = vector.load %arg26[%c8, %c0_28] : memref<16x32xf32, #tpu.memory_space<vmem>>, vector<8x16xf32>
    tpu.vector_store %arg26[%c8, %c0_28], %72 {strides = array<i32>} : memref<16x32xf32, #tpu.memory_space<vmem>>, vector<8x16xf32>,
    %74 = vector.extract_strided_slice %10 {offsets = [8, 16], sizes = [8, 16], strides = [1, 1]} : vector<16x96xf32> to vector<8x16xf32>
    %75 = vector.extract_strided_slice %10 {offsets = [8, 48], sizes = [8, 16], strides = [1, 1]} : vector<16x96xf32> to vector<8x16xf32>
    %76 = vector.extract_strided_slice %10 {offsets = [8, 80], sizes = [8, 16], strides = [1, 1]} : vector<16x96xf32> to vector<8x16xf32>
    %cst_29 = arith.constant dense<0.000000e+00> : vector<8x8xf32>
    %77 = tpu.matmul %74, %75, %cst_29 {dimension_numbers = #tpu.dot_dimension_numbers<[1], [1], [0], [0], [0, 0, 1, 0], [], []>} : vector<8x16xf32>, vector<8x16xf32>, vector<8x8xf32> -> vector<8x8xf32>
    %cst_30 = arith.constant 2.500000e-01 : f32
    %78 = vector.broadcast %cst_30 : f32 to vector<8x8xf32>
    %79 = arith.mulf %77, %78 : vector<8x8xf32>
    %80 = vector.broadcast %53 : vector<1x8xf32> to vector<8x8xf32>
    %81 = arith.addf %79, %80 : vector<8x8xf32>
    %cst_31 = arith.constant dense<0xFF800000> : vector<8xf32>
    %82 = vector.multi_reduction <maximumf>, %81, %cst_31 [1] : vector<8x8xf32> to vector<8xf32>
    %83 = vector.shape_cast %82 : vector<8xf32> to vector<8x1xf32>
    %84 = vector.broadcast %83 : vector<8x1xf32> to vector<8x8xf32>
    %85 = arith.subf %81, %84 : vector<8x8xf32>
    %86 = math.exp %85 : vector<8x8xf32>
    %cst_32 = arith.constant dense<0.000000e+00> : vector<8xf32>
    %87 = vector.multi_reduction <add>, %86, %cst_32 [1] : vector<8x8xf32> to vector<8xf32>
    %88 = vector.shape_cast %87 : vector<8xf32> to vector<8x1xf32>
    %89 = tpu.reciprocal %88 {approx = true} : vector<8x1xf32> -> vector<8x1xf32>
    %90 = vector.broadcast %89 : vector<8x1xf32> to vector<8x8xf32>
    %91 = arith.mulf %86, %90 : vector<8x8xf32>
    %cst_33 = arith.constant dense<0.000000e+00> : vector<8x16xf32>
    %92 = tpu.matmul %91, %76, %cst_33 {dimension_numbers = #tpu.dot_dimension_numbers<[1], [0], [0], [1], [0, 0, 1, 1], [], []>} : vector<8x8xf32>, vector<8x16xf32>, vector<8x16xf32> -> vector<8x16xf32>
    %c8_34 = arith.constant 8 : index
    %c16_35 = arith.constant 16 : index
    %93 = vector.load %arg26[%c8_34, %c16_35] : memref<16x32xf32, #tpu.memory_space<vmem>>, vector<8x16xf32>
    tpu.vector_store %arg26[%c8_34, %c16_35], %92 {strides = array<i32>} : memref<16x32xf32, #tpu.memory_space<vmem>>, vector<8x16xf32>,
    %c0_36 = arith.constant 0 : index
    %c0_37 = arith.constant 0 : index
    %94 = vector.load %arg26[%c0_36, %c0_37] : memref<16x32xf32, #tpu.memory_space<vmem>>, vector<16x32xf32>
    %c0_38 = arith.constant 0 : index
    %c0_39 = arith.constant 0 : index
    %c0_40 = arith.constant 0 : index
    %95 = vector.load %arg7[%c0_38, %c0_39, %c0_40] : memref<1x32x32xf32, #tpu.memory_space<vmem>>, vector<1x32x32xf32>
    %96 = vector.shape_cast %95 : vector<1x32x32xf32> to vector<32x32xf32>
    %cst_41 = arith.constant dense<0.000000e+00> : vector<16x32xf32>
    %97 = tpu.matmul %94, %96, %cst_41 {dimension_numbers = #tpu.dot_dimension_numbers<[1], [0], [0], [1], [0, 0, 1, 1], [], []>} : vector<16x32xf32>, vector<32x32xf32>, vector<16x32xf32> -> vector<16x32xf32>
    %c0_42 = arith.constant 0 : index
    %c0_43 = arith.constant 0 : index
    %c0_44 = arith.constant 0 : index
    %98 = vector.load %arg8[%c0_42, %c0_43, %c0_44] : memref<1x1x32xf32, #tpu.memory_space<vmem>>, vector<1x1x32xf32>
    %99 = vector.shape_cast %98 : vector<1x1x32xf32> to vector<1x32xf32>
    %100 = vector.broadcast %99 : vector<1x32xf32> to vector<16x32xf32>
    %101 = arith.addf %97, %100 : vector<16x32xf32>
    %102 = arith.addf %101, %3 : vector<16x32xf32>
    %c0_45 = arith.constant 0 : index
    %c0_46 = arith.constant 0 : index
    %c0_47 = arith.constant 0 : index
    %103 = vector.load %arg9[%c0_45, %c0_46, %c0_47] : memref<1x1x32xf32, #tpu.memory_space<vmem>>, vector<1x1x32xf32>
    %104 = vector.shape_cast %103 : vector<1x1x32xf32> to vector<1x32xf32>
    %c0_48 = arith.constant 0 : index
    %c0_49 = arith.constant 0 : index
    %c0_50 = arith.constant 0 : index
    %105 = vector.load %arg10[%c0_48, %c0_49, %c0_50] : memref<1x1x32xf32, #tpu.memory_space<vmem>>, vector<1x1x32xf32>
    %106 = vector.shape_cast %105 : vector<1x1x32xf32> to vector<1x32xf32>
    %cst_51 = arith.constant dense<0.000000e+00> : vector<16xf32>
    %107 = vector.multi_reduction <add>, %102, %cst_51 [1] : vector<16x32xf32> to vector<16xf32>
    %108 = vector.shape_cast %107 : vector<16xf32> to vector<16x1xf32>
    %cst_52 = arith.constant 3.200000e+01 : f32
    %109 = vector.broadcast %cst_52 : f32 to vector<16x1xf32>
    %110 = arith.divf %108, %109 : vector<16x1xf32>
    %111 = vector.broadcast %110 : vector<16x1xf32> to vector<16x32xf32>
    %112 = arith.subf %102, %111 : vector<16x32xf32>
    %113 = arith.mulf %112, %112 : vector<16x32xf32>
    %cst_53 = arith.constant dense<0.000000e+00> : vector<16xf32>
    %114 = vector.multi_reduction <add>, %113, %cst_53 [1] : vector<16x32xf32> to vector<16xf32>
    %115 = vector.shape_cast %114 : vector<16xf32> to vector<16x1xf32>
    %cst_54 = arith.constant 3.200000e+01 : f32
    %116 = vector.broadcast %cst_54 : f32 to vector<16x1xf32>
    %117 = arith.divf %115, %116 : vector<16x1xf32>
    %118 = vector.broadcast %110 : vector<16x1xf32> to vector<16x32xf32>
    %119 = arith.subf %102, %118 : vector<16x32xf32>
    %cst_55 = arith.constant 9.99999996E-13 : f32
    %120 = vector.broadcast %cst_55 : f32 to vector<16x1xf32>
    %121 = arith.addf %117, %120 : vector<16x1xf32>
    %122 = math.rsqrt %121 : vector<16x1xf32>
    %123 = vector.broadcast %122 : vector<16x1xf32> to vector<16x32xf32>
    %124 = arith.mulf %119, %123 : vector<16x32xf32>
    %125 = vector.broadcast %104 : vector<1x32xf32> to vector<16x32xf32>
    %126 = arith.mulf %124, %125 : vector<16x32xf32>
    %127 = vector.broadcast %106 : vector<1x32xf32> to vector<16x32xf32>
    %128 = arith.addf %126, %127 : vector<16x32xf32>
    %c0_56 = arith.constant 0 : index
    %c0_57 = arith.constant 0 : index
    %c0_58 = arith.constant 0 : index
    %129 = vector.load %arg11[%c0_56, %c0_57, %c0_58] : memref<1x32x64xf32, #tpu.memory_space<vmem>>, vector<1x32x64xf32>
    %130 = vector.shape_cast %129 : vector<1x32x64xf32> to vector<32x64xf32>
    %cst_59 = arith.constant dense<0.000000e+00> : vector<16x64xf32>
    %131 = tpu.matmul %128, %130, %cst_59 {dimension_numbers = #tpu.dot_dimension_numbers<[1], [0], [0], [1], [0, 0, 1, 1], [], []>} : vector<16x32xf32>, vector<32x64xf32>, vector<16x64xf32> -> vector<16x64xf32>
    %c0_60 = arith.constant 0 : index
    %c0_61 = arith.constant 0 : index
    %c0_62 = arith.constant 0 : index
    %132 = vector.load %arg12[%c0_60, %c0_61, %c0_62] : memref<1x1x64xf32, #tpu.memory_space<vmem>>, vector<1x1x64xf32>
    %133 = vector.shape_cast %132 : vector<1x1x64xf32> to vector<1x64xf32>
    %134 = vector.broadcast %133 : vector<1x64xf32> to vector<16x64xf32>
    %135 = arith.addf %131, %134 : vector<16x64xf32>
    %cst_63 = arith.constant 5.000000e-01 : f32
    %136 = vector.broadcast %cst_63 : f32 to vector<16x64xf32>
    %137 = arith.mulf %136, %135 : vector<16x64xf32>
    %cst_64 = arith.constant 4.471500e-02 : f32
    %138 = vector.broadcast %cst_64 : f32 to vector<16x64xf32>
    %139 = arith.mulf %138, %135 : vector<16x64xf32>
    %140 = arith.mulf %139, %135 : vector<16x64xf32>
    %141 = arith.mulf %140, %135 : vector<16x64xf32>
    %142 = arith.addf %135, %141 : vector<16x64xf32>
    %cst_65 = arith.constant 0.797884583 : f32
    %143 = vector.broadcast %cst_65 : f32 to vector<16x64xf32>
    %144 = arith.mulf %143, %142 : vector<16x64xf32>
    %145 = math.tanh %144 : vector<16x64xf32>
    %cst_66 = arith.constant 1.000000e+00 : f32
    %146 = vector.broadcast %cst_66 : f32 to vector<16x64xf32>
    %147 = arith.addf %146, %145 : vector<16x64xf32>
    %148 = arith.mulf %137, %147 : vector<16x64xf32>
    %c0_67 = arith.constant 0 : index
    %c0_68 = arith.constant 0 : index
    %c0_69 = arith.constant 0 : index
    %149 = vector.load %arg13[%c0_67, %c0_68, %c0_69] : memref<1x64x32xf32, #tpu.memory_space<vmem>>, vector<1x64x32xf32>
    %150 = vector.shape_cast %149 : vector<1x64x32xf32> to vector<64x32xf32>
    %cst_70 = arith.constant dense<0.000000e+00> : vector<16x32xf32>
    %151 = tpu.matmul %148, %150, %cst_70 {dimension_numbers = #tpu.dot_dimension_numbers<[1], [0], [0], [1], [0, 0, 1, 1], [], []>} : vector<16x64xf32>, vector<64x32xf32>, vector<16x32xf32> -> vector<16x32xf32>
    %c0_71 = arith.constant 0 : index
    %c0_72 = arith.constant 0 : index
    %c0_73 = arith.constant 0 : index
    %152 = vector.load %arg14[%c0_71, %c0_72, %c0_73] : memref<1x1x32xf32, #tpu.memory_space<vmem>>, vector<1x1x32xf32>
    %153 = vector.shape_cast %152 : vector<1x1x32xf32> to vector<1x32xf32>
    %154 = vector.broadcast %153 : vector<1x32xf32> to vector<16x32xf32>
    %155 = arith.addf %151, %154 : vector<16x32xf32>
    %156 = arith.addf %155, %128 : vector<16x32xf32>
    %c0_74 = arith.constant 0 : index
    %c0_75 = arith.constant 0 : index
    %c0_76 = arith.constant 0 : index
    %157 = vector.load %arg15[%c0_74, %c0_75, %c0_76] : memref<1x1x32xf32, #tpu.memory_space<vmem>>, vector<1x1x32xf32>
    %158 = vector.shape_cast %157 : vector<1x1x32xf32> to vector<1x32xf32>
    %c0_77 = arith.constant 0 : index
    %c0_78 = arith.constant 0 : index
    %c0_79 = arith.constant 0 : index
    %159 = vector.load %arg16[%c0_77, %c0_78, %c0_79] : memref<1x1x32xf32, #tpu.memory_space<vmem>>, vector<1x1x32xf32>
    %160 = vector.shape_cast %159 : vector<1x1x32xf32> to vector<1x32xf32>
    %cst_80 = arith.constant dense<0.000000e+00> : vector<16xf32>
    %161 = vector.multi_reduction <add>, %156, %cst_80 [1] : vector<16x32xf32> to vector<16xf32>
    %162 = vector.shape_cast %161 : vector<16xf32> to vector<16x1xf32>
    %cst_81 = arith.constant 3.200000e+01 : f32
    %163 = vector.broadcast %cst_81 : f32 to vector<16x1xf32>
    %164 = arith.divf %162, %163 : vector<16x1xf32>
    %165 = vector.broadcast %164 : vector<16x1xf32> to vector<16x32xf32>
    %166 = arith.subf %156, %165 : vector<16x32xf32>
    %167 = arith.mulf %166, %166 : vector<16x32xf32>
    %cst_82 = arith.constant dense<0.000000e+00> : vector<16xf32>
    %168 = vector.multi_reduction <add>, %167, %cst_82 [1] : vector<16x32xf32> to vector<16xf32>
    %169 = vector.shape_cast %168 : vector<16xf32> to vector<16x1xf32>
    %cst_83 = arith.constant 3.200000e+01 : f32
    %170 = vector.broadcast %cst_83 : f32 to vector<16x1xf32>
    %171 = arith.divf %169, %170 : vector<16x1xf32>
    %172 = vector.broadcast %164 : vector<16x1xf32> to vector<16x32xf32>
    %173 = arith.subf %156, %172 : vector<16x32xf32>
    %cst_84 = arith.constant 9.99999996E-13 : f32
    %174 = vector.broadcast %cst_84 : f32 to vector<16x1xf32>
    %175 = arith.addf %171, %174 : vector<16x1xf32>
    %176 = math.rsqrt %175 : vector<16x1xf32>
    %177 = vector.broadcast %176 : vector<16x1xf32> to vector<16x32xf32>
    %178 = arith.mulf %173, %177 : vector<16x32xf32>
    %179 = vector.broadcast %158 : vector<1x32xf32> to vector<16x32xf32>
    %180 = arith.mulf %178, %179 : vector<16x32xf32>
    %181 = vector.broadcast %160 : vector<1x32xf32> to vector<16x32xf32>
    %182 = arith.addf %180, %181 : vector<16x32xf32>
    %c0_85 = arith.constant 0 : index
    %c0_86 = arith.constant 0 : index
    %183 = vector.load %arg25[%c0_85, %c0_86] : memref<16x32xf32, #tpu.memory_space<vmem>>, vector<16x32xf32>
    tpu.vector_store %arg25[%c0_85, %c0_86], %182 {strides = array<i32>} : memref<16x32xf32, #tpu.memory_space<vmem>>, vector<16x32xf32>,
    %c1_i32 = arith.constant 1 : i32
    %184 = arith.cmpi eq, %arg0, %c1_i32 : i32
    %185 = arith.extui %184 : i1 to i32
    %c0_i32_87 = arith.constant 0 : i32
    %186 = arith.cmpi ne, %185, %c0_i32_87 : i32
    scf.if %186 {
      %c0_88 = arith.constant 0 : index
      %c0_89 = arith.constant 0 : index
      %187 = vector.load %arg17[%c0_88, %c0_89] : memref<32x32xf32, #tpu.memory_space<vmem>>, vector<32x32xf32>
      %cst_90 = arith.constant dense<0.000000e+00> : vector<16x32xf32>
      %188 = tpu.matmul %182, %187, %cst_90 {dimension_numbers = #tpu.dot_dimension_numbers<[1], [0], [0], [1], [0, 0, 1, 1], [], []>} : vector<16x32xf32>, vector<32x32xf32>, vector<16x32xf32> -> vector<16x32xf32>
      %c0_91 = arith.constant 0 : index
      %c0_92 = arith.constant 0 : index
      %189 = vector.load %arg18[%c0_91, %c0_92] : memref<1x32xf32, #tpu.memory_space<vmem>>, vector<1x32xf32>
      %190 = vector.broadcast %189 : vector<1x32xf32> to vector<16x32xf32>
      %191 = arith.addf %188, %190 : vector<16x32xf32>
      %192 = math.tanh %191 : vector<16x32xf32>
      %c0_93 = arith.constant 0 : index
      %c0_94 = arith.constant 0 : index
      %193 = vector.load %arg19[%c0_93, %c0_94] : memref<32x128xf32, #tpu.memory_space<vmem>>, vector<32x128xf32>
      %cst_95 = arith.constant dense<0.000000e+00> : vector<16x128xf32>
      %194 = tpu.matmul %192, %193, %cst_95 {dimension_numbers = #tpu.dot_dimension_numbers<[1], [0], [0], [1], [0, 0, 1, 1], [], []>} : vector<16x32xf32>, vector<32x128xf32>, vector<16x128xf32> -> vector<16x128xf32>
      %c0_96 = arith.constant 0 : index
      %c0_97 = arith.constant 0 : index
      %195 = vector.load %arg20[%c0_96, %c0_97] : memref<1x128xf32, #tpu.memory_space<vmem>>, vector<1x128xf32>
      %196 = vector.broadcast %195 : vector<1x128xf32> to vector<16x128xf32>
      %197 = arith.addf %194, %196 : vector<16x128xf32>
      %198 = vector.extract_strided_slice %197 {offsets = [0, 0], sizes = [1, 128], strides = [1, 1]} : vector<16x128xf32> to vector<1x128xf32>
      %c0_98 = arith.constant 0 : index
      %c0_99 = arith.constant 0 : index
      %199 = vector.load %arg23[%c0_98, %c0_99] : memref<2x128xf32, #tpu.memory_space<vmem>>, vector<1x128xf32>
      tpu.vector_store %arg23[%c0_98, %c0_99], %198 {strides = array<i32>} : memref<2x128xf32, #tpu.memory_space<vmem>>, vector<1x128xf32>,
      %200 = vector.extract_strided_slice %197 {offsets = [8, 0], sizes = [1, 128], strides = [1, 1]} : vector<16x128xf32> to vector<1x128xf32>
      %c1 = arith.constant 1 : index
      %c0_100 = arith.constant 0 : index
      %201 = vector.load %arg23[%c1, %c0_100] : memref<2x128xf32, #tpu.memory_space<vmem>>, vector<1x128xf32>
      tpu.vector_store %arg23[%c1, %c0_100], %200 {strides = array<i32>} : memref<2x128xf32, #tpu.memory_space<vmem>>, vector<1x128xf32>,
      %c0_101 = arith.constant 0 : index
      %c0_102 = arith.constant 0 : index
      %202 = vector.load %arg21[%c0_101, %c0_102] : memref<32x128xf32, #tpu.memory_space<vmem>>, vector<32x128xf32>
      %cst_103 = arith.constant dense<0.000000e+00> : vector<16x128xf32>
      %203 = tpu.matmul %182, %202, %cst_103 {dimension_numbers = #tpu.dot_dimension_numbers<[1], [0], [0], [1], [0, 0, 1, 1], [], []>} : vector<16x32xf32>, vector<32x128xf32>, vector<16x128xf32> -> vector<16x128xf32>
      %c0_104 = arith.constant 0 : index
      %c0_105 = arith.constant 0 : index
      %204 = vector.load %arg22[%c0_104, %c0_105] : memref<1x128xf32, #tpu.memory_space<vmem>>, vector<1x128xf32>
      %205 = vector.broadcast %204 : vector<1x128xf32> to vector<16x128xf32>
      %206 = arith.addf %203, %205 : vector<16x128xf32>
      %c0_106 = arith.constant 0 : index
      %c0_107 = arith.constant 0 : index
      %207 = vector.load %arg24[%c0_106, %c0_107] : memref<16x128xf32, #tpu.memory_space<vmem>>, vector<16x128xf32>
      tpu.vector_store %arg24[%c0_106, %c0_107], %206 {strides = array<i32>} : memref<16x128xf32, #tpu.memory_space<vmem>>, vector<16x128xf32>,
    } else {
    }
    return
  }
  func.func @transform_0(%arg0: i32) -> (i32, i32) {
    %c0_i32 = arith.constant 0 : i32
    %c0_i32_0 = arith.constant 0 : i32
    %c0_i32_1 = arith.constant 0 : i32
    return %c0_i32, %c0_i32_0 : i32, i32
  }
  func.func @transform_1(%arg0: i32) -> (i32, i32) {
    %c0_i32 = arith.constant 0 : i32
    %c0_i32_0 = arith.constant 0 : i32
    %c0_i32_1 = arith.constant 0 : i32
    return %c0_i32, %c0_i32_0 : i32, i32
  }
  func.func @transform_2(%arg0: i32) -> (i32, i32) {
    %c0_i32 = arith.constant 0 : i32
    %c0_i32_0 = arith.constant 0 : i32
    %c0_i32_1 = arith.constant 0 : i32
    return %c0_i32, %c0_i32_0 : i32, i32
  }
  func.func @transform_3(%arg0: i32) -> (i32, i32) {
    %c0_i32 = arith.constant 0 : i32
    %c0_i32_0 = arith.constant 0 : i32
    %c0_i32_1 = arith.constant 0 : i32
    return %c0_i32, %c0_i32_0 : i32, i32
  }
  func.func @transform_4(%arg0: i32) -> (i32, i32, i32) {
    %c0_i32 = arith.constant 0 : i32
    %c0_i32_0 = arith.constant 0 : i32
    %c0_i32_1 = arith.constant 0 : i32
    return %arg0, %c0_i32, %c0_i32_0 : i32, i32, i32
  }
  func.func @transform_5(%arg0: i32) -> (i32, i32, i32) {
    %c0_i32 = arith.constant 0 : i32
    %c0_i32_0 = arith.constant 0 : i32
    %c0_i32_1 = arith.constant 0 : i32
    return %arg0, %c0_i32, %c0_i32_0 : i32, i32, i32
  }
  func.func @transform_6(%arg0: i32) -> (i32, i32, i32) {
    %c0_i32 = arith.constant 0 : i32
    %c0_i32_0 = arith.constant 0 : i32
    %c0_i32_1 = arith.constant 0 : i32
    return %arg0, %c0_i32, %c0_i32_0 : i32, i32, i32
  }
  func.func @transform_7(%arg0: i32) -> (i32, i32, i32) {
    %c0_i32 = arith.constant 0 : i32
    %c0_i32_0 = arith.constant 0 : i32
    %c0_i32_1 = arith.constant 0 : i32
    return %arg0, %c0_i32, %c0_i32_0 : i32, i32, i32
  }
  func.func @transform_8(%arg0: i32) -> (i32, i32, i32) {
    %c0_i32 = arith.constant 0 : i32
    %c0_i32_0 = arith.constant 0 : i32
    %c0_i32_1 = arith.constant 0 : i32
    return %arg0, %c0_i32, %c0_i32_0 : i32, i32, i32
  }
  func.func @transform_9(%arg0: i32) -> (i32, i32, i32) {
    %c0_i32 = arith.constant 0 : i32
    %c0_i32_0 = arith.constant 0 : i32
    %c0_i32_1 = arith.constant 0 : i32
    return %arg0, %c0_i32, %c0_i32_0 : i32, i32, i32
  }
  func.func @transform_10(%arg0: i32) -> (i32, i32, i32) {
    %c0_i32 = arith.constant 0 : i32
    %c0_i32_0 = arith.constant 0 : i32
    %c0_i32_1 = arith.constant 0 : i32
    return %arg0, %c0_i32, %c0_i32_0 : i32, i32, i32
  }
  func.func @transform_11(%arg0: i32) -> (i32, i32, i32) {
    %c0_i32 = arith.constant 0 : i32
    %c0_i32_0 = arith.constant 0 : i32
    %c0_i32_1 = arith.constant 0 : i32
    return %arg0, %c0_i32, %c0_i32_0 : i32, i32, i32
  }
  func.func @transform_12(%arg0: i32) -> (i32, i32, i32) {
    %c0_i32 = arith.constant 0 : i32
    %c0_i32_0 = arith.constant 0 : i32
    %c0_i32_1 = arith.constant 0 : i32
    return %arg0, %c0_i32, %c0_i32_0 : i32, i32, i32
  }
  func.func @transform_13(%arg0: i32) -> (i32, i32, i32) {
    %c0_i32 = arith.constant 0 : i32
    %c0_i32_0 = arith.constant 0 : i32
    %c0_i32_1 = arith.constant 0 : i32
    return %arg0, %c0_i32, %c0_i32_0 : i32, i32, i32
  }
  func.func @transform_14(%arg0: i32) -> (i32, i32, i32) {
    %c0_i32 = arith.constant 0 : i32
    %c0_i32_0 = arith.constant 0 : i32
    %c0_i32_1 = arith.constant 0 : i32
    return %arg0, %c0_i32, %c0_i32_0 : i32, i32, i32
  }
  func.func @transform_15(%arg0: i32) -> (i32, i32, i32) {
    %c0_i32 = arith.constant 0 : i32
    %c0_i32_0 = arith.constant 0 : i32
    %c0_i32_1 = arith.constant 0 : i32
    return %arg0, %c0_i32, %c0_i32_0 : i32, i32, i32
  }
  func.func @transform_16(%arg0: i32) -> (i32, i32) {
    %c0_i32 = arith.constant 0 : i32
    %c0_i32_0 = arith.constant 0 : i32
    %c0_i32_1 = arith.constant 0 : i32
    return %c0_i32, %c0_i32_0 : i32, i32
  }
  func.func @transform_17(%arg0: i32) -> (i32, i32) {
    %c0_i32 = arith.constant 0 : i32
    %c0_i32_0 = arith.constant 0 : i32
    %c0_i32_1 = arith.constant 0 : i32
    return %c0_i32, %c0_i32_0 : i32, i32
  }
  func.func @transform_18(%arg0: i32) -> (i32, i32) {
    %c0_i32 = arith.constant 0 : i32
    %c0_i32_0 = arith.constant 0 : i32
    %c0_i32_1 = arith.constant 0 : i32
    return %c0_i32, %c0_i32_0 : i32, i32
  }
  func.func @transform_19(%arg0: i32) -> (i32, i32) {
    %c0_i32 = arith.constant 0 : i32
    %c0_i32_0 = arith.constant 0 : i32
    %c0_i32_1 = arith.constant 0 : i32
    return %c0_i32, %c0_i32_0 : i32, i32
  }
  func.func @transform_20(%arg0: i32) -> (i32, i32) {
    %c0_i32 = arith.constant 0 : i32
    %c0_i32_0 = arith.constant 0 : i32
    %c0_i32_1 = arith.constant 0 : i32
    return %c0_i32, %c0_i32_0 : i32, i32
  }
  func.func @transform_21(%arg0: i32) -> (i32, i32) {
    %c0_i32 = arith.constant 0 : i32
    %c0_i32_0 = arith.constant 0 : i32
    %c0_i32_1 = arith.constant 0 : i32
    return %c0_i32, %c0_i32_0 : i32, i32
  }
  func.func @transform_22(%arg0: i32) -> (i32, i32) {
    %c0_i32 = arith.constant 0 : i32
    %c0_i32_0 = arith.constant 0 : i32
    %c0_i32_1 = arith.constant 0 : i32
    return %c0_i32, %c0_i32_0 : i32, i32
  }
  func.func @transform_23(%arg0: i32) -> (i32, i32) {
    %c0_i32 = arith.constant 0 : i32
    %c0_i32_0 = arith.constant 0 : i32
    %c0_i32_1 = arith.constant 0 : i32
    return %c0_i32, %c0_i32_0 : i32, i32
  }
}

</mosaic_0001>

<bundles_post_ra>
// kernel: bert_intent_slot_forward.1
= control target key start
LH: loop header
LB: loop body
LE: loop exit
PB: predicated region body
PF: predicated region fallthrough
CT: control target
= control target key end

     0   :  { %s3329_s0 = inlined_call_operand.vmem [shape: f32[16,32], index: 0, kind: input, shape index: {}]   ;;  %s3330_s1 = inlined_call_operand.vmem [shape: f32[2,8], index: 1, kind: input, shape index: {}]   ;;  %s3331_s2 = inlined_call_operand.vmem [shape: f32[1,32], index: 2, kind: input, shape index: {}]   ;;  %s3332_s3 = inlined_call_operand.vmem [shape: f32[1,32], index: 3, kind: input, shape index: {}]   ;;  %s3333_s4 = inlined_call_operand.vmem [shape: f32[2,32,96], index: 4, kind: input, shape index: {}]   ;;  %s3334_s5 = inlined_call_operand.vmem [shape: f32[2,1,96], index: 5, kind: input, shape index: {}]   ;;  %s3335_s6 = inlined_call_operand.vmem [shape: f32[2,32,32], index: 6, kind: input, shape index: {}]   ;;  %s3336_s7 = inlined_call_operand.vmem [shape: f32[2,1,32], index: 7, kind: input, shape index: {}]   ;;  %s3337_s8 = inlined_call_operand.vmem [shape: f32[2,1,32], index: 8, kind: input, shape index: {}]   ;;  %s3338_s9 = inlined_call_operand.vmem [shape: f32[2,1,32], index: 9, kind: input, shape index: {}]   ;;  %s3339_s10 = inlined_call_operand.vmem [shape: f32[2,32,64], index: 10, kind: input, shape index: {}]   ;;  %s3340_s11 = inlined_call_operand.vmem [shape: f32[2,1,64], index: 11, kind: input, shape index: {}]   ;;  %s3341_s12 = inlined_call_operand.vmem [shape: f32[2,64,32], index: 12, kind: input, shape index: {}]   ;;  %s3342_s13 = inlined_call_operand.vmem [shape: f32[2,1,32], index: 13, kind: input, shape index: {}]   ;;  %s3343_s14 = inlined_call_operand.vmem [shape: f32[2,1,32], index: 14, kind: input, shape index: {}]   ;;  %s3344_s15 = inlined_call_operand.vmem [shape: f32[2,1,32], index: 15, kind: input, shape index: {}]   ;;  %s3345_s16 = inlined_call_operand.vmem [shape: f32[32,32], index: 16, kind: input, shape index: {}]   ;;  %s3346_s17 = inlined_call_operand.vmem [shape: f32[1,32], index: 17, kind: input, shape index: {}]   ;;  %s3347_s18 = inlined_call_operand.vmem [shape: f32[32,128], index: 18, kind: input, shape index: {}]   ;;  %s3348_s19 = inlined_call_operand.vmem [shape: f32[1,128], index: 19, kind: input, shape index: {}]   ;;  %s3349_s20 = inlined_call_operand.vmem [shape: f32[32,128], index: 20, kind: input, shape index: {}]   ;;  %s3350_s21 = inlined_call_operand.vmem [shape: f32[1,128], index: 21, kind: input, shape index: {}]   ;;  %s3351_s22 = inlined_call_operand.hbm [shape: f32[2,128], index: 22, kind: output, shape index: {0}]   ;;  %s3352_s23 = inlined_call_operand.vmem [shape: f32[16,128], index: 23, kind: output, shape index: {1}]  }
   0x1   :  { %3358 = sst [smem:[#allocation8_spill]] %s3329_s0 }
   0x2   :  { %3359 = sst [smem:[#allocation9_spill]] %s3330_s1 }
   0x3   :  { %3360 = sst [smem:[#allocation10_spill]] %s3331_s2 }
   0x4   :  { %3361 = sst [smem:[#allocation11_spill]] %s3332_s3 }
   0x5   :  { %3362 = sst [smem:[#allocation12_spill]] %s3333_s4 }
   0x6   :  { %3363 = sst [smem:[#allocation13_spill]] %s3334_s5 }
   0x7   :  { %3364 = sst [smem:[#allocation14_spill]] %s3335_s6 }
   0x8   :  { %3365 = sst [smem:[#allocation15_spill]] %s3336_s7 }
   0x9   :  { %3366 = sst [smem:[#allocation16_spill]] %s3346_s17 }
   0xa   :  { %3367 = sst [smem:[#allocation17_spill]] %s3347_s18 }
   0xb   :  { %3368 = sst [smem:[#allocation18_spill]] %s3348_s19 }
   0xc   :  { %3369 = sst [smem:[#allocation19_spill]] %s3349_s20 }
   0xd   :  { %3370 = sst [smem:[#allocation20_spill]] %s3350_s21 }
   0xe   :  { %3371 = sst [smem:[#allocation21_spill]] %s3351_s22 }
   0xf   :  { %3372 = sst [smem:[#allocation22_spill]] %s3352_s23 }
  0x10   :  { %29 = vsyncpa [#allocation5], 0  ;;  %s3014_s4 = smov 0  }
  0x11 LB: > { %3373 = sst [smem:[#allocation7_spill]] %s2883_s4  ;;  %s3020_s30 = sadd.s32 4294967295, %s2883_s4   ;;  %s2883_s4 = sphi %s3014_s4, %s35_s4  }
  0x12   : > { %p2545_p0 = scmp.ge.s32.totalorder %s2883_s4, 1  ;;  %p725_p1 = scmp.lt.s32.totalorder %s2883_s4, 3 }
  0x14   : > { %p726_p2 = pnand %p2545_p0, %p725_p1 }
  0x15   : > { %p823_p3 = scmp.lt.s32.totalorder (!%p726_p2), %s3020_s30, 1  ;;  %s3375_s7 = sld [smem:[#allocation12_spill]] (!%p726_p2) }
  0x16   : > { %729 = sbr.rel (%p726_p2) target bundleno = 3199 (0xc7f), region = 108  ;;  %s3376_s0 = sld [smem:[#allocation14_spill]] (!%p726_p2) }
  0x17   : > { %s3377_s23 = sld [smem:[#allocation15_spill]] (!%p726_p2)  ;;  %p2554_p4 = scmp.ne.s32.totalorder (!%p726_p2), %s3020_s30, 0 }
  0x1b   : > { %s3026_s24 = scalar_select %p823_p3, %s3020_s30, 1 }
  0x1c   : > { %s3378_s19 = sld [smem:[#allocation8_spill]] (!%p2554_p4) }
  0x1d   : > { %s2599_s25 = sshll.u32 %s3026_s24, 5  ;;  %s838_s21 = scalar_lea.vmem %s3377_s23, %s3026_s24 }
  0x1e   : > { %s3036_s28 = scalar_lea.vmem %s3375_s7, %s2599_s25  ;;  %s3041_s4 = scalar_lea.vmem %s3376_s0, %s2599_s25 }
  0x1f   : > { %s3058_s7 = scalar_lea.vmem %s3339_s10, %s2599_s25  ;;  %s852_s0 = scalar_lea.vmem %s3340_s11, %s3026_s24 }
  0x20   : > { %s2602_s2 = sshll.u32 %s3026_s24, 6  ;;  %s860_s5 = scalar_lea.vmem %s3342_s13, %s3026_s24 }
  0x21   : > { %s3068_s23 = scalar_lea.vmem %s3341_s12, %s2602_s2  ;;  %s863_s6 = scalar_lea.vmem %s3343_s14, %s3026_s24 }
  0x22   : > { %s866_s20 = scalar_lea.vmem %s3344_s15, %s3026_s24  ;;  %870 = sbr.rel (%p2554_p4) target bundleno = 353 (0x161), region = 112 }
  0x23   : > { %s3379_s18 = sld [smem:[#allocation10_spill]] (!%p2554_p4) }
  0x24   : > { %s3380_s27 = sld [smem:[#allocation11_spill]] (!%p2554_p4) }
  0x27   : > { %v871_v0 = vld [vmem:[%s3378_s19] sm:$0xff]  ;;  %vm875_vm0 = vcmask 261120   ;;  %v872_v1 = vld [vmem:[%s3378_s19 + $0x8] sm:$0xff] }
  0x28   : > { %v876_v2 = vsel %vm875_vm0, %v871_v0, 0.0  ;;  %v879_v3 = vsel %vm875_vm0, %v872_v1, 0.0 }
  0x29   : > { %877 = vadd.xlane.f32.xlu0 %v876_v2  ;;  %v2555_v21 = vld [vmem:[%s3379_s18] ss:$0 sm:$0xff] }
  0x2a   : > { %v2556_v23 = vld [vmem:[%s3380_s27] ss:$0 sm:$0xff] }
  0x2d   : > { %880 = vadd.xlane.f32.xlu0 %v879_v3 }
  0xb2   : > { %v878_v4 = vpop.xlane.xlu0 %877 }
  0xb3   : > { %v883_v5 = vmul.f32 0.03125, %v878_v4 }
  0xb5   : > { %v885_v6 = vsub.f32 %v871_v0, %v883_v5 }
  0xb6   : > { %v881_v7 = vpop.xlane.xlu0 %880 }
  0xb7   : > { %v884_v8 = vmul.f32 0.03125, %v881_v7  ;;  %v887_v9 = vmul.f32 %v885_v6, %v885_v6 }
  0xb9   : > { %v886_v10 = vsub.f32 %v872_v1, %v884_v8  ;;  %v889_v11 = vsel %vm875_vm0, %v887_v9, 0.0 }
  0xba   : > { %890 = vadd.xlane.f32.xlu1 %v889_v11 }
  0xbb   : > { %v888_v12 = vmul.f32 %v886_v10, %v886_v10 }
  0xbd   : > { %v892_v13 = vsel %vm875_vm0, %v888_v12, 0.0 }
  0xbe   : > { %893 = vadd.xlane.f32.xlu1 %v892_v13 }
 0x143   : > { %v891_v14 = vpop.xlane.xlu1 %890 }
 0x144   : > { %v895_v15 = vmul.f32 0.03125, %v891_v14 }
 0x146   : > { %v897_v16 = vadd.f32 1e-12, %v895_v15 }
 0x147   : > { %v894_v17 = vpop.xlane.xlu1 %893 }
 0x148   : > { %2813 = vrsqrt.f32 %v897_v16  ;;  %v896_v18 = vmul.f32 0.03125, %v894_v17 }
 0x14a   : > { %v898_v19 = vadd.f32 1e-12, %v896_v18 }
 0x14c   : > { %2815 = vrsqrt.f32 %v898_v19 }
 0x155   : > { %v2814_v20 = vpop.eup %2813 }
 0x156   : > { %v901_v22 = vmul.f32 %v2814_v20, %v885_v6 }
 0x158   : > { %v909_v24 = vmul.f32 %v2555_v21, %v901_v22 }
 0x159   : > { %v2816_v25 = vpop.eup %2815 }
 0x15a   : > { %v917_v26 = vadd.f32 %v2556_v23, %v909_v24  ;;  %v902_v27 = vmul.f32 %v2816_v25, %v886_v10 }
 0x15c   : > { %919 = vst.msk [vmem:[#allocation2] sm:$0xff] %vm875_vm0, %v917_v26  ;;  %v910_v28 = vmul.f32 %v2555_v21, %v902_v27 }
 0x15e   : > { %v918_v29 = vadd.f32 %v2556_v23, %v910_v28 }
 0x160   : > { %920 = vst.msk [vmem:[#allocation2 + $0x8] sm:$0xff] %vm875_vm0, %v918_v29 }
 0x161 PF: > { %v926_v30 = vld [vmem:[%s3036_s28 + $0x18] sm:$0xff]  ;;  %v925_v31 = vld [vmem:[%s3036_s28 + $0x10] sm:$0xff]  ;;  %vm934_vm1 = vcmask 261120   ;;  %v924_v33 = vld [vmem:[%s3036_s28 + $0x8] sm:$0xff]  ;;  %v2885_v36 = vmov 0.0   ;;  %vm2886_vm2 = vmmov 0   ;;  %v1096_v48 = vlaneseq  ;;  %s3386_s18 = scalar_lea.vmem %s3338_s9, %s3026_s24 }
 0x162   : > { %2665 = vmatprep.subr.mxu1 %v926_v30  ;;  %v923_v34 = vld [vmem:[%s3036_s28] sm:$0xff]  ;;  %2686 = vmatprep.subr.mxu0 %v2885_v36  ;;  %s3381_s3 = sld [smem:[#allocation13_spill]]  ;;  %s2887_s22 = smov 112   ;;  %vm1020_vm3 = vcmask 130048   ;;  %vm1101_vm4 = vcmask 64512   ;;  %vm1361_vm5 = vcmask 261248  }
 0x163   : > { %v3103_v32 = vld [vmem:[#allocation2] sm:$0xff]  ;;  %2666 = vmatpush3.msra.mxu1 %v926_v30  ;;  %2688 = vmatprep.mubr.msk.f32.mxu0 %vm2886_vm2, %v2885_v36  ;;  %s2888_s26 = smov 96   ;;  %s2889_s17 = smov 80   ;;  %v1097_v49 = vshrl.u32 %v1096_v48, 7  ;;  %vm1972_vm6 = vcmask 523264  }
 0x164   : > { %2673 = vmatprep.mubr.msk.f32.mxu1 %vm934_vm1, %v3103_v32  ;;  %2667 = vmatprep.subr.mxu1 %v925_v31  ;;  %s3383_s25 = sld [smem:[#allocation9_spill]]  ;;  %s2890_s27 = smov 64  }
 0x165   : > { %2668 = vmatpush3.msra.mxu1 %v925_v31  ;;  %v1098_v50 = vsub.s32 0, %v1097_v49  ;;  %v1443_v57 = vsub.s32 1, %v1097_v49  ;;  %s2891_s28 = smov 48   ;;  %s2892_s29 = smov 16  }
 0x166   : > { %2669 = vmatprep.subr.mxu1 %v924_v33  ;;  %p2585_p5 = scmp.ne.s32.totalorder %s3020_s30, 1 }
 0x167   : > { %2670 = vmatpush3.msra.mxu1 %v924_v33  ;;  %v3109_v35 = vld [vmem:[#allocation2 + $0x8] sm:$0xff]  ;;  %s3390_s1 = sld [smem:[#allocation20_spill]] (!%p2585_p5) }
 0x168   : > { %2671 = vmatprep.subr.mxu1 %v923_v34  ;;  %s3382_s2 = scalar_lea.vmem %s3381_s3, %s3026_s24 }
 0x169   : > { %2672 = vmatpush3.msra.mxu1 %v923_v34  ;;  %v2557_v38 = vld [vmem:[%s3382_s2] ss:$0 sm:$0xff] }
 0x16a   : > { %2674 = vmatmul.mubr.msk.f32.vlgmr.msra.gmra.mxu1 %vm934_vm1, %v3109_v35  ;;  %2676 = vmatprep.subr.mxu1 %v2885_v36  ;;  %v1016_v51 = vld [vmem:[%s3383_s25] sm:$0x3]  ;;  %s3388_s25 = sld [smem:[#allocation17_spill]] (!%p2585_p5) }
 0x16b   : > { %2678 = vmatprep.mubr.msk.f32.mxu1 %vm2886_vm2, %v2885_v36  ;;  %v1099_v52 = vrot.slane %v1016_v51, %v1098_v50  ;;  %v1444_v63 = vrot.slane %v1016_v51, %v1443_v57  ;;  %v1711_v51 = vld [vmem:[%s3041_s4 + $0x18] sm:$0xff] }
 0x22a   : > { %v2675_v37 = vpop.f32.mrf.mxu1 }
 0x22b   : > { %v3128_v41 = vadd.f32 %v2675_v37, %v2557_v38 }
 0x22c   : > { %v1007_v39 = vpop.f32.mrf.mxu1 }
 0x22d   : > { %v3124_v40 = vadd.f32 %v2557_v38, %v1007_v39 }
 0x22f   : > { %1190 = vrot.lane.b32.xlu1 %v3124_v40, %s2887_s22  ;;  %1018 = vrot.lane.b32.xlu0 %v3124_v40, %s2888_s26 }
 0x233   : > { %1364 = vrot.lane.b32.xlu1 %v3128_v41, %s2888_s26  ;;  %1192 = vrot.lane.b32.xlu0 %v3124_v40, %s2889_s17  ;;  %s3385_s26 = scalar_lea.vmem %s3337_s8, %s3026_s24 }
 0x237   : > { %1534 = vrot.lane.b32.xlu1 %v3128_v41, %s2887_s22  ;;  %1536 = vrot.lane.b32.xlu0 %v3128_v41, %s2889_s17  ;;  %s3387_s17 = sld [smem:[#allocation19_spill]] (!%p2585_p5) }
 0x2a1   : > { %v1019_v42 = vpop.permute.xlu0 %1018  ;;  %v1191_v43 = vpop.permute.xlu1 %1190 }
 0x2a2   : > { %2677 = vmatpush3.xpose.msk.msra.mxu1 %vm1020_vm3, %v1019_v42 }
 0x2a3   : > { %2681 = vmatprep.subr.mxu1 %v2885_v36 }
 0x2a5   : > { %2679 = vmatmul.mubr.msk.f32.vlgmr.msra.gmra.mxu1 %vm1020_vm3, %v3124_v40  ;;  %v1193_v44 = vpop.permute.xlu0 %1192  ;;  %v1365_v45 = vpop.permute.xlu1 %1364 }
 0x2a6   : > { %2687 = vmatpush3.xpose.msk.msra.mxu0 %vm1020_vm3, %v1193_v44  ;;  %2683 = vmatprep.mubr.msk.f32.mxu1 %vm2886_vm2, %v2885_v36 }
 0x2a7   : > { %2696 = vmatprep.subr.mxu0 %v2885_v36 }
 0x2a9   : > { %2689 = vmatmul.mubr.msk.f32.vlgmr.msra.gmra.mxu0 %vm1020_vm3, %v1191_v43  ;;  %v1537_v46 = vpop.permute.xlu0 %1536  ;;  %v1535_v47 = vpop.permute.xlu1 %1534 }
 0x2aa   : > { %2697 = vmatpush3.xpose.msk.msra.mxu0 %vm1020_vm3, %v1365_v45  ;;  %2698 = vmatprep.mubr.msk.f32.mxu0 %vm2886_vm2, %v2885_v36 }
 0x2ab   : > { %2706 = vmatprep.subr.mxu0 %v2885_v36 }
 0x2ad   : > { %2699 = vmatmul.mubr.msk.f32.vlgmr.msra.gmra.mxu0 %vm1020_vm3, %v3128_v41 }
 0x2ae   : > { %2707 = vmatpush3.xpose.msk.msra.mxu0 %vm1020_vm3, %v1537_v46  ;;  %2708 = vmatprep.mubr.msk.f32.mxu0 %vm2886_vm2, %v2885_v36 }
 0x2af   : > { %2716 = vmatprep.subr.mxu0 %v1711_v51 }
 0x2b1   : > { %2709 = vmatmul.mubr.msk.f32.vlgmr.msra.gmra.mxu0 %vm1020_vm3, %v1535_v47 }
 0x2b2   : > { %2717 = vmatpush3.msra.mxu0 %v1711_v51 }
 0x365   : > { %v1091_v53 = vpop.f32.mrf.mxu1 }
 0x366   : > { %v1095_v54 = vmul.f32 0.25, %v1091_v53 }
 0x367   : > { %v2680_v55 = vpop.f32.mrf.mxu1 }
 0x368   : > { %v1100_v56 = vadd.f32 %v1099_v52, %v1095_v54  ;;  %v1709_v54 = vld [vmem:[%s3041_s4 + $0x8] sm:$0xff] }
 0x369   : > { %v1264_v58 = vpop.f32.mrf.mxu0 }
 0x36a   : > { %v1268_v59 = vmul.f32 0.25, %v1264_v58  ;;  %v1102_v60 = vsel %vm1101_vm4, %v1100_v56, -inf }
 0x36b   : > { %1103 = vmax.xlane.f32.xlu0 %v1102_v60  ;;  %v2690_v61 = vpop.f32.mrf.mxu0 }
 0x36c   : > { %v1269_v62 = vadd.f32 %v1268_v59, %v1099_v52  ;;  %v1710_v52 = vld [vmem:[%s3041_s4 + $0x10] sm:$0xff] }
 0x36d   : > { %v1436_v0 = vpop.f32.mrf.mxu0  ;;  %2718 = vmatprep.subr.mxu0 %v1710_v52 }
 0x36e   : > { %v1440_v1 = vmul.f32 0.25, %v1436_v0  ;;  %v1270_v2 = vsel %vm1101_vm4, %v1269_v62, -inf  ;;  %2719 = vmatpush3.msra.mxu0 %v1710_v52 }
 0x36f   : > { %1271 = vmax.xlane.f32.xlu1 %v1270_v2  ;;  %v2700_v3 = vpop.f32.mrf.mxu0  ;;  %2720 = vmatprep.subr.mxu0 %v1709_v54 }
 0x370   : > { %v1445_v4 = vadd.f32 %v1444_v63, %v1440_v1  ;;  %2721 = vmatpush3.msra.mxu0 %v1709_v54  ;;  %v2572_v1 = vld [vmem:[%s838_s21] ss:$0 sm:$0xff] }
 0x371   : > { %v1608_v5 = vpop.f32.mrf.mxu0 }
 0x372   : > { %v1612_v6 = vmul.f32 0.25, %v1608_v5  ;;  %v1446_v7 = vsel %vm1101_vm4, %v1445_v4, -inf }
 0x373   : > { %1447 = vmax.xlane.f32.xlu0 %v1446_v7  ;;  %v2710_v8 = vpop.f32.mrf.mxu0 }
 0x374   : > { %v1613_v9 = vadd.f32 %v1612_v6, %v1444_v63 }
 0x376   : > { %v1614_v10 = vsel %vm1101_vm4, %v1613_v9, -inf }
 0x377   : > { %1615 = vmax.xlane.f32.xlu0 %v1614_v10 }
 0x380   : > { %1113 = vrot.lane.b32.xlu1 %v3124_v40, %s2890_s27 }
 0x3f4   : > { %v1104_v11 = vpop.xlane.xlu0 %1103 }
 0x3f5   : > { %v1105_v12 = vsub.f32 %v1100_v56, %v1104_v11  ;;  %v1708_v56 = vld [vmem:[%s3041_s4] sm:$0xff]  ;;  %s3392_s4 = sld [smem:[#allocation18_spill]] (!%p2585_p5) }
 0x3f6   : > { %2722 = vmatprep.subr.mxu0 %v1708_v56 }
 0x3f7   : > { %v1106_v13 = vmul.f32 1.442695, %v1105_v12  ;;  %2723 = vmatpush3.msra.mxu0 %v1708_v56 }
 0x3f8   : > { %v1272_v14 = vpop.xlane.xlu1 %1271 }
 0x3f9   : > { %2817 = vpow2.f32 %v1106_v13  ;;  %v1273_v15 = vsub.f32 %v1269_v62, %v1272_v14 }
 0x3fb   : > { %v1274_v16 = vmul.f32 1.442695, %v1273_v15 }
 0x3fc   : > { %v1114_v17 = vpop.permute.xlu1 %1113  ;;  %v1448_v18 = vpop.xlane.xlu0 %1447 }
 0x3fd   : > { %2819 = vpow2.f32 %v1274_v16  ;;  %v1449_v19 = vsub.f32 %v1445_v4, %v1448_v18  ;;  %2682 = vmatpush3.msra.mxu1 %v1114_v17  ;;  %v1850_v18 = vld [vmem:[%s3058_s7 + $0x18] sm:$0xff] }
 0x3fe   : > { %2691 = vmatprep.subr.mxu1 %v2885_v36 }
 0x3ff   : > { %v1450_v20 = vmul.f32 1.442695, %v1449_v19  ;;  %v1849_v19 = vld [vmem:[%s3058_s7 + $0x10] sm:$0xff] }
 0x400   : > { %v1616_v21 = vpop.xlane.xlu0 %1615 }
 0x401   : > { %2821 = vpow2.f32 %v1450_v20  ;;  %v1617_v22 = vsub.f32 %v1613_v9, %v1616_v21  ;;  %v1848_v20 = vld [vmem:[%s3058_s7 + $0x8] sm:$0xff]  ;;  %v1847_v21 = vld [vmem:[%s3058_s7] sm:$0xff] }
 0x403   : > { %v1618_v23 = vmul.f32 1.442695, %v1617_v22 }
 0x405   : > { %2823 = vpow2.f32 %v1618_v23 }
 0x406   : > { %v2818_v24 = vpop.eup %2817 }
 0x407   : > { %v1108_v25 = vsel %vm1101_vm4, %v2818_v24, 0.0 }
 0x408   : > { %1109 = vadd.xlane.f32.xlu1 %v1108_v25 }
 0x40a   : > { %v2820_v26 = vpop.eup %2819 }
 0x40b   : > { %v1276_v27 = vsel %vm1101_vm4, %v2820_v26, 0.0 }
 0x40c   : > { %1277 = vadd.xlane.f32.xlu0 %v1276_v27 }
 0x40e   : > { %v2822_v28 = vpop.eup %2821 }
 0x40f   : > { %v1452_v29 = vsel %vm1101_vm4, %v2822_v28, 0.0 }
 0x410   : > { %1453 = vadd.xlane.f32.xlu1 %v1452_v29  ;;  %v2575_v29 = vld [vmem:[%s3385_s26] ss:$0 sm:$0xff]  ;;  %s3389_s26 = sld [smem:[#allocation16_spill]] (!%p2585_p5) }
 0x412   : > { %v2824_v30 = vpop.eup %2823 }
 0x413   : > { %v1620_v31 = vsel %vm1101_vm4, %v2824_v30, 0.0 }
 0x414   : > { %1621 = vadd.xlane.f32.xlu0 %v1620_v31  ;;  %v2576_v31 = vld [vmem:[%s3386_s18] ss:$0 sm:$0xff] }
 0x421   : > { %1457 = vrot.lane.b32.xlu1 %v3128_v41, %s2890_s27 }
 0x425   : > { %1625 = vrot.lane.b32.xlu1 %v3128_v41, %s2891_s28 }
 0x42a   : > { %1281 = vrot.lane.b32.xlu0 %v3124_v40, %s2891_s28 }
 0x491   : > { %v1110_v33 = vpop.xlane.xlu1 %1109 }
 0x492   : > { %2825 = vrcp.f32 %v1110_v33 }
 0x495   : > { %v1278_v34 = vpop.xlane.xlu0 %1277 }
 0x496   : > { %2827 = vrcp.f32 %v1278_v34 }
 0x499   : > { %v1454_v37 = vpop.xlane.xlu1 %1453 }
 0x49a   : > { %2829 = vrcp.f32 %v1454_v37 }
 0x49d   : > { %v1622_v38 = vpop.xlane.xlu0 %1621  ;;  %v1458_v41 = vpop.permute.xlu1 %1457 }
 0x49e   : > { %2831 = vrcp.f32 %v1622_v38 }
 0x49f   : > { %v2826_v39 = vpop.eup %2825 }
 0x4a0   : > { %v1112_v42 = vmul.f32 %v2826_v39, %v2818_v24 }
 0x4a1   : > { %v1282_v43 = vpop.permute.xlu0 %1281  ;;  %v1626_v47 = vpop.permute.xlu1 %1625 }
 0x4a2   : > { %2684 = vmatmul.mubr.msk.f32.vlgmr.msra.gmra.mxu1 %vm1101_vm4, %v1112_v42 }
 0x4a3   : > { %v2828_v44 = vpop.eup %2827  ;;  %2692 = vmatpush3.msra.mxu1 %v1282_v43  ;;  %2693 = vmatprep.mubr.msk.f32.mxu1 %vm2886_vm2, %v2885_v36  ;;  %v1964_v43 = vld [vmem:[%s3068_s23 + $0x38] sm:$0xff] }
 0x4a4   : > { %2701 = vmatprep.subr.mxu1 %v2885_v36  ;;  %v1280_v40 = vmul.f32 %v2828_v44, %v2820_v26  ;;  %v1963_v44 = vld [vmem:[%s3068_s23 + $0x30] sm:$0xff]  ;;  %2738 = vmatprep.subr.mxu0 %v1964_v43 }
 0x4a6   : > { %2694 = vmatmul.mubr.msk.f32.vlgmr.msra.gmra.mxu1 %vm1101_vm4, %v1280_v40  ;;  %v1961_v40 = vld [vmem:[%s3068_s23 + $0x20] sm:$0xff] }
 0x4a7   : > { %v2830_v45 = vpop.eup %2829  ;;  %2702 = vmatpush3.msra.mxu1 %v1458_v41  ;;  %2703 = vmatprep.mubr.msk.f32.mxu1 %vm2886_vm2, %v2885_v36  ;;  %v1962_v41 = vld [vmem:[%s3068_s23 + $0x28] sm:$0xff] }
 0x4a8   : > { %2711 = vmatprep.subr.mxu1 %v2885_v36  ;;  %v1456_v46 = vmul.f32 %v2830_v45, %v2822_v28  ;;  %v1960_v45 = vld [vmem:[%s3068_s23 + $0x18] sm:$0xff] }
 0x4aa   : > { %2704 = vmatmul.mubr.msk.f32.vlgmr.msra.gmra.mxu1 %vm1101_vm4, %v1456_v46  ;;  %v1959_v46 = vld [vmem:[%s3068_s23 + $0x10] sm:$0xff] }
 0x4ab   : > { %v2832_v48 = vpop.eup %2831  ;;  %2712 = vmatpush3.msra.mxu1 %v1626_v47  ;;  %2713 = vmatprep.mubr.msk.f32.mxu1 %vm2886_vm2, %v2885_v36  ;;  %v1958_v47 = vld [vmem:[%s3068_s23 + $0x8] sm:$0xff] }
 0x4ac   : > { %v1624_v49 = vmul.f32 %v2832_v48, %v2824_v30  ;;  %2727 = vmatprep.subr.mxu1 %v1850_v18  ;;  %v1957_v48 = vld [vmem:[%s3068_s23] sm:$0xff] }
 0x4ae   : > { %2714 = vmatmul.mubr.msk.f32.vlgmr.msra.gmra.mxu1 %vm1101_vm4, %v1624_v49  ;;  %v2577_v49 = vld [vmem:[%s852_s0] ss:$0 sm:$0xff] }
 0x4af   : > { %2728 = vmatpush3.msra.mxu1 %v1850_v18 }
 0x4b0   : > { %2729 = vmatprep.subr.mxu1 %v1849_v19 }
 0x4b1   : > { %2730 = vmatpush3.msra.mxu1 %v1849_v19 }
 0x4b2   : > { %2731 = vmatprep.subr.mxu1 %v1848_v20 }
 0x4b3   : > { %2732 = vmatpush3.msra.mxu1 %v1848_v20 }
 0x4b4   : > { %2733 = vmatprep.subr.mxu1 %v1847_v21 }
 0x4b5   : > { %2734 = vmatpush3.msra.mxu1 %v1847_v21 }
 0x562   : > { %v1185_v50 = vpop.f32.mrf.mxu1 }
 0x563   : > { %1189 = vst.msk [vmem:[#allocation3] sm:$0xff] %vm1020_vm3, %v1185_v50 }
 0x564   : > { %v2685_v53 = vpop.f32.mrf.mxu1 }
 0x566   : > { %v1353_v55 = vpop.f32.mrf.mxu1 }
 0x567   : > { %1358 = vrot.lane.b32.xlu0 %v1353_v55, %s2892_s29 }
 0x568   : > { %v2695_v36 = vpop.f32.mrf.mxu1 }
 0x56a   : > { %v1529_v57 = vpop.f32.mrf.mxu1 }
 0x56b   : > { %1533 = vst.msk [vmem:[#allocation3 + $0x8] sm:$0xff] %vm1020_vm3, %v1529_v57 }
 0x56c   : > { %v2705_v58 = vpop.f32.mrf.mxu1 }
 0x56e   : > { %v1697_v59 = vpop.f32.mrf.mxu1 }
 0x56f   : > { %1702 = vrot.lane.b32.xlu1 %v1697_v59, %s2892_s29 }
 0x570   : > { %v2715_v60 = vpop.f32.mrf.mxu1 }
 0x5d9   : > { %v1359_v61 = vpop.permute.xlu0 %1358 }
 0x5da   : > { %1362 = vst.msk [vmem:[#allocation3] sm:$0xff] %vm1361_vm5, %v1359_v61 }
 0x5e1   : > { %v1703_v62 = vpop.permute.xlu1 %1702  ;;  %v1706_v63 = vld [vmem:[#allocation3] sm:$0xff] }
 0x5e2   : > { %1705 = vst.msk [vmem:[#allocation3 + $0x8] sm:$0xff] %vm1361_vm5, %v1703_v62  ;;  %2724 = vmatprep.mubr.msk.f32.mxu0 %vm934_vm1, %v1706_v63 }
 0x5e9   : > { %v1707_v0 = vld [vmem:[#allocation3 + $0x8] sm:$0xff] }
 0x5ea   : > { %2725 = vmatmul.mubr.msk.f32.vlgmr.msra.gmra.mxu0 %vm934_vm1, %v1707_v0 }
 0x5eb   : > { %2739 = vmatpush3.msra.mxu0 %v1964_v43 }
 0x5ec   : > { %2740 = vmatprep.subr.mxu0 %v1963_v44 }
 0x5ed   : > { %2741 = vmatpush3.msra.mxu0 %v1963_v44 }
 0x5ee   : > { %2742 = vmatprep.subr.mxu0 %v1962_v41 }
 0x5ef   : > { %2743 = vmatpush3.msra.mxu0 %v1962_v41 }
 0x5f0   : > { %2744 = vmatprep.subr.mxu0 %v1961_v40 }
 0x5f1   : > { %2745 = vmatpush3.msra.mxu0 %v1961_v40 }
 0x5f2   : > { %2746 = vmatprep.subr.mxu0 %v1960_v45 }
 0x5f3   : > { %2747 = vmatpush3.msra.mxu0 %v1960_v45 }
 0x5f4   : > { %2748 = vmatprep.subr.mxu0 %v1959_v46 }
 0x5f5   : > { %2749 = vmatpush3.msra.mxu0 %v1959_v46 }
 0x5f6   : > { %2750 = vmatprep.subr.mxu0 %v1958_v47 }
 0x5f7   : > { %2751 = vmatpush3.msra.mxu0 %v1958_v47 }
 0x5f8   : > { %2752 = vmatprep.subr.mxu0 %v1957_v48 }
 0x5f9   : > { %2753 = vmatpush3.msra.mxu0 %v1957_v48 }
 0x6aa   : > { %v2726_v2 = vpop.f32.mrf.mxu0 }
 0x6ab   : > { %v1797_v3 = vadd.f32 %v2726_v2, %v2572_v1 }
 0x6ac   : > { %v1791_v4 = vpop.f32.mrf.mxu0 }
 0x6ad   : > { %v1792_v5 = vadd.f32 %v2572_v1, %v1791_v4  ;;  %v1801_v6 = vadd.f32 %v1797_v3, %v3109_v35 }
 0x6af   : > { %v1807_v7 = vsel %vm934_vm1, %v1801_v6, 0.0  ;;  %v1800_v8 = vadd.f32 %v1792_v5, %v3103_v32 }
 0x6b0   : > { %1808 = vadd.xlane.f32.xlu1 %v1807_v7  ;;  %v2580_v7 = vld [vmem:[%s860_s5] ss:$0 sm:$0xff]  ;;  %s3391_s5 = sld [smem:[#allocation22_spill]] (!%p2585_p5) }
 0x6b1   : > { %v1804_v9 = vsel %vm934_vm1, %v1800_v8, 0.0 }
 0x6b2   : > { %1805 = vadd.xlane.f32.xlu0 %v1804_v9 }
 0x739   : > { %v1809_v10 = vpop.xlane.xlu1 %1808 }
 0x73a   : > { %v1812_v11 = vmul.f32 0.03125, %v1809_v10 }
 0x73b   : > { %v1806_v12 = vpop.xlane.xlu0 %1805 }
 0x73c   : > { %v1811_v13 = vmul.f32 0.03125, %v1806_v12  ;;  %v1814_v14 = vsub.f32 %v1801_v6, %v1812_v11 }
 0x73e   : > { %v1813_v15 = vsub.f32 %v1800_v8, %v1811_v13  ;;  %v1816_v17 = vmul.f32 %v1814_v14, %v1814_v14 }
 0x740   : > { %v1815_v16 = vmul.f32 %v1813_v15, %v1813_v15  ;;  %v1820_v32 = vsel %vm934_vm1, %v1816_v17, 0.0 }
 0x742   : > { %v1817_v35 = vsel %vm934_vm1, %v1815_v16, 0.0 }
 0x743   : > { %1818 = vadd.xlane.f32.xlu0 %v1817_v35 }
 0x747   : > { %1821 = vadd.xlane.f32.xlu0 %v1820_v32 }
 0x7cc   : > { %v1819_v22 = vpop.xlane.xlu0 %1818 }
 0x7cd   : > { %v1823_v23 = vmul.f32 0.03125, %v1819_v22 }
 0x7cf   : > { %v1825_v24 = vadd.f32 1e-12, %v1823_v23 }
 0x7d0   : > { %v1822_v25 = vpop.xlane.xlu0 %1821 }
 0x7d1   : > { %2833 = vrsqrt.f32 %v1825_v24  ;;  %v1824_v26 = vmul.f32 0.03125, %v1822_v25 }
 0x7d3   : > { %v1826_v27 = vadd.f32 1e-12, %v1824_v26 }
 0x7d5   : > { %2835 = vrsqrt.f32 %v1826_v27 }
 0x7de   : > { %v2834_v28 = vpop.eup %2833 }
 0x7df   : > { %v1829_v30 = vmul.f32 %v2834_v28, %v1813_v15 }
 0x7e1   : > { %v1837_v33 = vmul.f32 %v2575_v29, %v1829_v30 }
 0x7e2   : > { %v2836_v34 = vpop.eup %2835 }
 0x7e3   : > { %v1830_v37 = vmul.f32 %v2836_v34, %v1814_v14  ;;  %v3216_v38 = vadd.f32 %v2576_v31, %v1837_v33 }
 0x7e5   : > { %v1838_v39 = vmul.f32 %v2575_v29, %v1830_v37  ;;  %2735 = vmatprep.mubr.msk.f32.mxu1 %vm934_vm1, %v3216_v38  ;;  %v2584_v37 = vld [vmem:[%s866_s20] ss:$0 sm:$0xff] }
 0x7e7   : > { %v1846_v42 = vadd.f32 %v2576_v31, %v1838_v39  ;;  %v2583_v31 = vld [vmem:[%s863_s6] ss:$0 sm:$0xff] }
 0x7e9   : > { %2736 = vmatmul.mubr.msk.f32.vlgmr.msra.gmra.mxu1 %vm934_vm1, %v1846_v42 }
 0x8a9   : > { %v2737_v50 = vpop.f32.mrf.mxu1 }
 0x8aa   : > { %v1936_v51 = vadd.f32 %v2737_v50, %v2577_v49 }
 0x8ab   : > { %v1930_v52 = vpop.f32.mrf.mxu1 }
 0x8ac   : > { %v1942_v53 = vmul.f32 0.044715, %v1936_v51  ;;  %v1931_v54 = vadd.f32 %v2577_v49, %v1930_v52  ;;  %v1940_v4 = vmul.f32 0.5, %v1936_v51 }
 0x8ae   : > { %v1944_v55 = vmul.f32 %v1942_v53, %v1936_v51  ;;  %v1941_v56 = vmul.f32 0.044715, %v1931_v54  ;;  %v1939_v2 = vmul.f32 0.5, %v1931_v54 }
 0x8b0   : > { %v1946_v36 = vmul.f32 %v1944_v55, %v1936_v51  ;;  %v1943_v57 = vmul.f32 %v1941_v56, %v1931_v54 }
 0x8b2   : > { %v1948_v58 = vadd.f32 %v1946_v36, %v1936_v51  ;;  %v1945_v59 = vmul.f32 %v1943_v57, %v1931_v54 }
 0x8b4   : > { %v1950_v60 = vmul.f32 0.7978846, %v1948_v58  ;;  %v1947_v61 = vadd.f32 %v1945_v59, %v1931_v54 }
 0x8b6   : > { %2837 = vtanh.f32 %v1950_v60  ;;  %v1949_v62 = vmul.f32 0.7978846, %v1947_v61 }
 0x8b8   : > { %2839 = vtanh.f32 %v1949_v62 }
 0x8c3   : > { %v2838_v63 = vpop.eup %2837 }
 0x8c4   : > { %v1954_v1 = vadd.f32 1.0, %v2838_v63 }
 0x8c5   : > { %v2840_v0 = vpop.eup %2839 }
 0x8c6   : > { %v1953_v3 = vadd.f32 1.0, %v2840_v0  ;;  %v1956_v6 = vmul.f32 %v1954_v1, %v1940_v4 }
 0x8c8   : > { %v1955_v5 = vmul.f32 %v1953_v3, %v1939_v2 }
 0x8ca   : > { %2754 = vmatprep.mubr.msk.f32.mxu0 %vm1972_vm6, %v1955_v5 }
 0x8cb   : > { %2755 = vmatmul.mubr.msk.f32.vlgmr.msra.gmra.mxu0 %vm1972_vm6, %v1956_v6 }
 0x98b   : > { %v2756_v8 = vpop.f32.mrf.mxu0 }
 0x98c   : > { %v2051_v9 = vadd.f32 %v2756_v8, %v2580_v7 }
 0x98d   : > { %v2045_v10 = vpop.f32.mrf.mxu0 }
 0x98e   : > { %v2046_v11 = vadd.f32 %v2580_v7, %v2045_v10  ;;  %v2055_v12 = vadd.f32 %v2051_v9, %v1846_v42 }
 0x990   : > { %v2061_v13 = vsel %vm934_vm1, %v2055_v12, 0.0  ;;  %v2054_v14 = vadd.f32 %v2046_v11, %v3216_v38 }
 0x991   : > { %2062 = vadd.xlane.f32.xlu0 %v2061_v13 }
 0x992   : > { %v2058_v15 = vsel %vm934_vm1, %v2054_v14, 0.0 }
 0x993   : > { %2059 = vadd.xlane.f32.xlu1 %v2058_v15 }
 0xa1a   : > { %v2063_v16 = vpop.xlane.xlu0 %2062 }
 0xa1b   : > { %v2065_v35 = vmul.f32 0.03125, %v2063_v16 }
 0xa1c   : > { %v2060_v17 = vpop.xlane.xlu1 %2059 }
 0xa1d   : > { %v2067_v32 = vsub.f32 %v2055_v12, %v2065_v35  ;;  %v2064_v18 = vmul.f32 0.03125, %v2060_v17 }
 0xa1f   : > { %v2066_v19 = vsub.f32 %v2054_v14, %v2064_v18  ;;  %v2069_v20 = vmul.f32 %v2067_v32, %v2067_v32 }
 0xa21   : > { %v2073_v21 = vsel %vm934_vm1, %v2069_v20, 0.0  ;;  %v2068_v22 = vmul.f32 %v2066_v19, %v2066_v19 }
 0xa22   : > { %2074 = vadd.xlane.f32.xlu0 %v2073_v21 }
 0xa23   : > { %v2070_v23 = vsel %vm934_vm1, %v2068_v22, 0.0 }
 0xa24   : > { %2071 = vadd.xlane.f32.xlu1 %v2070_v23 }
 0xaab   : > { %v2075_v24 = vpop.xlane.xlu0 %2074 }
 0xaac   : > { %v2077_v25 = vmul.f32 0.03125, %v2075_v24 }
 0xaad   : > { %v2072_v26 = vpop.xlane.xlu1 %2071 }
 0xaae   : > { %v2079_v27 = vadd.f32 1e-12, %v2077_v25  ;;  %v2076_v28 = vmul.f32 0.03125, %v2072_v26 }
 0xab0   : > { %2841 = vrsqrt.f32 %v2079_v27  ;;  %v2078_v29 = vadd.f32 1e-12, %v2076_v28 }
 0xab2   : > { %2843 = vrsqrt.f32 %v2078_v29 }
 0xabd   : > { %v2842_v30 = vpop.eup %2841 }
 0xabe   : > { %v2083_v33 = vmul.f32 %v2842_v30, %v2067_v32 }
 0xabf   : > { %v2844_v34 = vpop.eup %2843 }
 0xac0   : > { %v2091_v38 = vmul.f32 %v2583_v31, %v2083_v33  ;;  %v2082_v39 = vmul.f32 %v2844_v34, %v2066_v19 }
 0xac2   : > { %v2099_v42 = vadd.f32 %v2584_v37, %v2091_v38  ;;  %v2090_v43 = vmul.f32 %v2583_v31, %v2082_v39  ;;  %2105 = sbr.rel (%p2585_p5) target bundleno = 3178 (0xc6a), region = 116 }
 0xac4   : > { %2101 = vst.msk [vmem:[#allocation2 + $0x8] sm:$0xff] %vm934_vm1, %v2099_v42  ;;  %v2098_v44 = vadd.f32 %v2584_v37, %v2090_v43 }
 0xac6   : > { %2100 = vst.msk [vmem:[#allocation2] sm:$0xff] %vm934_vm1, %v2098_v44 }
 0xac7   : > { %v2109_v41 = vld [vmem:[%s3345_s16 + $0x18] sm:$0xff]  ;;  %v2108_v40 = vld [vmem:[%s3345_s16 + $0x10] sm:$0xff]  ;;  %2765 = vmatprep.mubr.msk.f32.mxu0 %vm934_vm1, %v2098_v44  ;;  %v2107_v45 = vld [vmem:[%s3345_s16 + $0x8] sm:$0xff] }
 0xac8   : > { %2757 = vmatprep.subr.mxu0 %v2109_v41  ;;  %v2106_v46 = vld [vmem:[%s3345_s16] sm:$0xff]  ;;  %v2297_v47 = vld [vmem:[%s3387_s17 + $0x18] sm:$0xff]  ;;  %v2296_v49 = vld [vmem:[%s3387_s17 + $0x10] sm:$0xff] }
 0xac9   : > { %2758 = vmatpush3.msra.mxu0 %v2109_v41  ;;  %v2203_v48 = vld [vmem:[%s3388_s25 + $0x18] sm:$0xff]  ;;  %v2202_v50 = vld [vmem:[%s3388_s25 + $0x10] sm:$0xff]  ;;  %v2295_v51 = vld [vmem:[%s3387_s17 + $0x8] sm:$0xff] }
 0xaca   : > { %2759 = vmatprep.subr.mxu0 %v2108_v40  ;;  %2768 = vmatprep.subr.mxu1 %v2203_v48  ;;  %v2201_v52 = vld [vmem:[%s3388_s25 + $0x8] sm:$0xff]  ;;  %v2294_v53 = vld [vmem:[%s3387_s17] sm:$0xff] }
 0xacb   : > { %2760 = vmatpush3.msra.mxu0 %v2108_v40  ;;  %2769 = vmatpush3.msra.mxu1 %v2203_v48  ;;  %v2200_v54 = vld [vmem:[%s3388_s25] sm:$0xff] }
 0xacc   : > { %2761 = vmatprep.subr.mxu0 %v2107_v45  ;;  %2770 = vmatprep.subr.mxu1 %v2202_v50  ;;  %v2586_v55 = vld [vmem:[%s3389_s26] ss:$0 sm:$0xff] }
 0xacd   : > { %2762 = vmatpush3.msra.mxu0 %v2107_v45  ;;  %2771 = vmatpush3.msra.mxu1 %v2202_v50  ;;  %v2592_v61 = vld [vmem:[%s3390_s1] ss:$0 sm:$0xff] }
 0xace   : > { %2763 = vmatprep.subr.mxu0 %v2106_v46  ;;  %2772 = vmatprep.subr.mxu1 %v2201_v52  ;;  %v2589_v2 = vld [vmem:[%s3392_s4] ss:$0 sm:$0xff] }
 0xacf   : > { %2764 = vmatpush3.msra.mxu0 %v2106_v46  ;;  %2773 = vmatpush3.msra.mxu1 %v2201_v52 }
 0xad0   : > { %2766 = vmatmul.mubr.msk.f32.vlgmr.msra.gmra.mxu0 %vm934_vm1, %v2099_v42  ;;  %2779 = vmatprep.subr.mxu0 %v2297_v47 }
 0xad1   : > { %2787 = vmatprep.mubr.msk.f32.mxu0 %vm934_vm1, %v2098_v44  ;;  %2780 = vmatpush3.msra.mxu0 %v2297_v47 }
 0xad2   : > { %2781 = vmatprep.subr.mxu0 %v2296_v49  ;;  %2774 = vmatprep.subr.mxu1 %v2200_v54 }
 0xad3   : > { %2782 = vmatpush3.msra.mxu0 %v2296_v49  ;;  %2775 = vmatpush3.msra.mxu1 %v2200_v54 }
 0xad4   : > { %2783 = vmatprep.subr.mxu0 %v2295_v51 }
 0xad5   : > { %2784 = vmatpush3.msra.mxu0 %v2295_v51 }
 0xad6   : > { %2785 = vmatprep.subr.mxu0 %v2294_v53 }
 0xad7   : > { %2786 = vmatpush3.msra.mxu0 %v2294_v53 }
 0xad8   : > { %2788 = vmatmul.mubr.msk.f32.vlgmr.msra.gmra.mxu0 %vm934_vm1, %v2099_v42 }
 0xb90   : > { %v2767_v56 = vpop.f32.mrf.mxu0 }
 0xb91   : > { %v2195_v36 = vadd.f32 %v2767_v56, %v2586_v55 }
 0xb92   : > { %v2189_v57 = vpop.f32.mrf.mxu0 }
 0xb93   : > { %v2190_v58 = vadd.f32 %v2586_v55, %v2189_v57 }
 0xb95   : > { %2845 = vtanh.f32 %v2190_v58 }
 0xb96   : > { %2847 = vtanh.f32 %v2195_v36 }
 0xb98   : > { %v2789_v62 = vpop.f32.mrf.mxu0 }
 0xb99   : > { %v2377_v63 = vadd.f32 %v2789_v62, %v2592_v61 }
 0xb9a   : > { %v2371_v0 = vpop.f32.mrf.mxu0 }
 0xb9b   : > { %2381 = vst [vmem:[%s3391_s5 + $0x8] sm:$0xff] %v2377_v63  ;;  %v2372_v1 = vadd.f32 %v2592_v61, %v2371_v0 }
 0xb9d   : > { %2380 = vst [vmem:[%s3391_s5] sm:$0xff] %v2372_v1 }
 0xba2   : > { %v2846_v59 = vpop.eup %2845 }
 0xba3   : > { %v2848_v60 = vpop.eup %2847  ;;  %2776 = vmatprep.mubr.msk.f32.mxu1 %vm934_vm1, %v2846_v59 }
 0xba4   : > { %2777 = vmatmul.mubr.msk.f32.vlgmr.msra.gmra.mxu1 %vm934_vm1, %v2848_v60 }
 0xc64   : > { %v2778_v3 = vpop.f32.mrf.mxu1 }
 0xc65   : > { %v2289_v4 = vadd.f32 %v2778_v3, %v2589_v2 }
 0xc66   : > { %v2283_v5 = vpop.f32.mrf.mxu1 }
 0xc67   : > { %2293 = vst [vmem:[#allocation4 + $0x1] sm:$0x1] %v2289_v4  ;;  %v2284_v6 = vadd.f32 %v2589_v2, %v2283_v5 }
 0xc69   : > { %2292 = vst [vmem:[#allocation4] sm:$0x1] %v2284_v6 }
 0xc6a PF: > { %p2794_p6 = scmp.eq.s32.totalorder %s3020_s30, 1  ;;  %s2893_s3 = smov [#allocation4]  }
 0xc6b   : > { %s2389_s2 = sshll.u32 %s2893_s3, 4  ;;  %s2390_s2 = int_to_ptr.vmem [resolvable:$true] %s2389_s2 }
 0xc6c   : > { %s2849_s20 = scalar_lea.vmem %s2390_s2, 32  ;;  %p2856_p10 = scmp.lt.s32.totalorder %s2390_s2, %s2390_s2 }
 0xc6d   : > { %p2850_p7 = scmp.ne.s32.totalorder %s2390_s2, %s2849_s20  ;;  %p2857_p11 = scmp.lt.s32.totalorder %s2849_s20, %s2849_s20 }
 0xc6f   : > { %p2851_p8 = pnand %p2850_p7, %p2794_p6  ;;  %p2858_p12 = por %p2857_p11, %p2856_p10 }
 0xc71   : > { %p2852_p9 = pneg %p2851_p8 }
 0xc73   : > { %p2859_p13 = pnand %p2858_p12, %p2852_p9 }
 0xc75   : > { %2862 = shalt.err (!%p2859_p13)
}
 0xc76   : > { %s3393_s22 = sld [smem:[#allocation21_spill]] }
 0xc7c   : > { %2791 = dma.vmem_to_hbm [thread:$0]  (%p2794_p6), %s2390_s2, 32, %s3393_s22, [#allocation5]  }
 0xc7d   : > { %2878 = dma.done.wait (%p2794_p6), [#allocation5], 32  }
 0xc7e   : > { %2880 = vsyncadd (%p2794_p6), [#allocation5], 4294967264 }
 0xc7f PF: > { %s3394_s26 = sld [smem:[#allocation7_spill]] }
 0xc85   : > { %s35_s4 = sadd.s32 1, %s3394_s26  }
 0xc86   : > { %p32_p0 = scmp.ge.s32.totalorder %s35_s4, 4  }
 0xc88   :  { %34 = sbr.rel (!%p32_p0) target bundleno = 17 (0x11), region = 184 }
 0xc8d   :  { %2408 = vsyncpa [#allocation5], 1 }
 0xc8e   :  { %2410 = vsyncpa [#allocation5 + $0x1], 1 }

</bundles_post_ra>
